<compile_context>
chip_gen: v7x
topology: tpu7x:2x2x1
jax: 0.10.0
libtpu: 0.0.40
codegen_flags: <defaults>
</compile_context>

<pallas_src>
import math

import jax
import jax.numpy as jnp
import numpy as np
from jax.experimental import pallas as pl
from jax.experimental.pallas import tpu as pltpu  # noqa: F401  (TPU backend)


# ----------------------------- config -----------------------------------
HIDDEN_DIM = 64
N_HEADS = 8
HEAD_DIM = HIDDEN_DIM // N_HEADS
N_MASKS = min(5, N_HEADS)                 # len(self.dilations)
DILATIONS = [2 ** i for i in range(N_MASKS)]
BATCH = 2
SEQ = 16
PACKED = N_HEADS * SEQ                    # 128: heads packed on the lane axis
NEG_BIG = 1e9                             # additive-mask magnitude


def generate_masks(seq_len: int) -> np.ndarray:
    """Log-sparse masks, identical to PyramidalAttention._generate_masks."""
    idx = np.arange(seq_len)
    diff = np.abs(idx[:, None] - idx[None, :])
    masks = np.zeros((N_MASKS, seq_len, seq_len), dtype=np.float32)
    for h, dilation in enumerate(DILATIONS):
        m = (diff <= dilation) | (diff % (2 ** (1 + h)) == 0)
        masks[h] = m.astype(np.float32)
    return masks


def build_selectors():
    """0/1 block-diagonal selectors for the head-packed formulation."""
    ksel = np.zeros((HIDDEN_DIM, PACKED), np.float32)     # (64, 128)
    vsel = np.zeros((PACKED, HIDDEN_DIM), np.float32)     # (128, 64)
    bones = np.zeros((PACKED, PACKED), np.float32)        # (128, 128)
    for h in range(N_HEADS):
        ksel[h * HEAD_DIM:(h + 1) * HEAD_DIM, h * SEQ:(h + 1) * SEQ] = 1.0
        vsel[h * SEQ:(h + 1) * SEQ, h * HEAD_DIM:(h + 1) * HEAD_DIM] = 1.0
        bones[h * SEQ:(h + 1) * SEQ, h * SEQ:(h + 1) * SEQ] = 1.0
    return ksel, vsel, bones


# ----------------------------- kernel ------------------------------------
def pyramidal_attn_kernel(x_ref, wqkv_ref, bqkv_ref, mask_ref, ksel_ref,
                          vsel_ref, bones_ref, wobd_ref, bo2_ref, out_ref):
    scale = 1.0 / math.sqrt(HEAD_DIM)

    # Fused Q/K/V projection for all batch rows at once:
    # (B*S, H) x (H, 3H) with bf16 MXU operands and f32 accumulation.
    x = x_ref[...]                                                   # (32, 64) f32
    qkv = jnp.dot(x.astype(jnp.bfloat16), wqkv_ref[...],
                  preferred_element_type=jnp.float32) + bqkv_ref[...]  # (32, 192)

    mask = mask_ref[...]                                             # (16, 128) f32
    ksel = ksel_ref[...]                                             # (64, 128) f32
    vsel = vsel_ref[...]                                             # (128, 64) f32

    head_cat = []
    for b in range(BATCH):                                           # unrolled (B=2)
        rows = slice(b * SEQ, (b + 1) * SEQ)
        q = qkv[rows, 0:HIDDEN_DIM]                                  # (16, 64)
        k = qkv[rows, HIDDEN_DIM:2 * HIDDEN_DIM]                     # (16, 64)
        v = qkv[rows, 2 * HIDDEN_DIM:3 * HIDDEN_DIM]                 # (16, 64)

        # Block-diagonal K^T: Kbd[h*8+d, h*16+t] = k[t, h*8+d], zero elsewhere.
        kbd = jnp.concatenate([k.T] * N_HEADS, axis=1) * ksel         # (64, 128)

        # All-heads scores in one lane-dense tile: (16,64) x (64,128).
        scores = jnp.dot(q.astype(jnp.bfloat16), kbd.astype(jnp.bfloat16),
                         preferred_element_type=jnp.float32)
        scores = scores * scale + mask                                # f32 mask add

        # Per-head softmax on the packed tile (f32 throughout; masked -> 0).
        row_max = jnp.max(scores, axis=-1, keepdims=True)
        exps = jnp.exp(scores - row_max)                              # (16, 128)
        denom = jnp.dot(exps.astype(jnp.bfloat16), bones_ref[...],
                        preferred_element_type=jnp.float32)           # per-head sums
        probs = exps / denom                                          # exact divide

        # Block-diagonal V: Vbd[h*16+t, h*8+d] = v[t, h*8+d]; the PV matmul
        # directly yields the concatenated head outputs (16, 64).
        vbd = jnp.concatenate([v] * N_HEADS, axis=0) * vsel            # (128, 64)
        head_cat.append(jnp.dot(probs.astype(jnp.bfloat16),
                                vbd.astype(jnp.bfloat16),
                                preferred_element_type=jnp.float32))

    # Lane-dense output projection: both batch elements side by side on the
    # lane axis through a block-diagonal Wo^T -> one (16,128)x(128,128) matmul
    # and a single full-width (unmasked) store.
    cat_packed = jnp.concatenate(head_cat, axis=1)                     # (16, 128)
    out_ref[...] = jnp.dot(cat_packed.astype(jnp.bfloat16), wobd_ref[...],
                           preferred_element_type=jnp.float32) + bo2_ref[...]


def pyramidal_attention(x, wqkv_bf16, bqkv, mask_packed, ksel, vsel,
                        bones_bf16, wobd_bf16, bo2):
    B, S, H = x.shape
    x_flat = x.reshape(B * S, H)
    out_packed = pl.pallas_call(
        pyramidal_attn_kernel,
        out_shape=jax.ShapeDtypeStruct((S, B * H), jnp.float32),
        grid=(1,),                                           # single grid step
        in_specs=[
            pl.BlockSpec((B * S, H), lambda i: (0, 0)),              # x (flat)
            pl.BlockSpec((H, 3 * H), lambda i: (0, 0)),              # W_qkv bf16
            pl.BlockSpec((1, 3 * H), lambda i: (0, 0)),              # b_qkv
            pl.BlockSpec((S, N_HEADS * S), lambda i: (0, 0)),        # packed mask
            pl.BlockSpec((H, N_HEADS * S), lambda i: (0, 0)),        # K selector
            pl.BlockSpec((N_HEADS * S, H), lambda i: (0, 0)),        # V selector
            pl.BlockSpec((N_HEADS * S, N_HEADS * S), lambda i: (0, 0)),  # block-ones
            pl.BlockSpec((B * H, B * H), lambda i: (0, 0)),          # blkdiag Wo^T
            pl.BlockSpec((1, B * H), lambda i: (0, 0)),              # packed bias
        ],
        out_specs=pl.BlockSpec((S, B * H), lambda i: (0, 0)),
    )(x_flat, wqkv_bf16, bqkv, mask_packed, ksel, vsel, bones_bf16,
      wobd_bf16, bo2)
    # (S, B*H) lane-packed slab -> (B, S, H)
    return jnp.transpose(out_packed.reshape(S, B, H), (1, 0, 2))


# ------------------------- pure-JAX reference -----------------------------
def reference_forward(x, wq, bq, wk, bk, wv, bv, masks, wo, bo):
    head_outs = []
    for h in range(N_HEADS):
        q = x @ wq[h].T + bq[h, 0]
        k = x @ wk[h].T + bk[h, 0]
        v = x @ wv[h].T + bv[h, 0]
        scores = jnp.einsum('bsd,btd->bst', q, k) / math.sqrt(HEAD_DIM)
        m = masks[min(h, N_MASKS - 1)]
        scores = jnp.where(m[None] == 0.0, -jnp.inf, scores)
        probs = jax.nn.softmax(scores, axis=-1)
        head_outs.append(jnp.einsum('bst,btd->bsd', probs, v))
    concat = jnp.concatenate(head_outs, axis=-1)
    return concat @ wo.T + bo


# ------------------------------- main -------------------------------------
if __name__ == "__main__":
    key = jax.random.PRNGKey(0)
    keys = jax.random.split(key, 10)

    x = jax.random.normal(keys[0], (BATCH, SEQ, HIDDEN_DIM), jnp.float32)

    bound = 1.0 / math.sqrt(HIDDEN_DIM)
    wq = jax.random.uniform(keys[1], (N_HEADS, HEAD_DIM, HIDDEN_DIM),
                            jnp.float32, -bound, bound)
    bq = jax.random.uniform(keys[2], (N_HEADS, 1, HEAD_DIM),
                            jnp.float32, -bound, bound)
    wk = jax.random.uniform(keys[3], (N_HEADS, HEAD_DIM, HIDDEN_DIM),
                            jnp.float32, -bound, bound)
    bk = jax.random.uniform(keys[4], (N_HEADS, 1, HEAD_DIM),
                            jnp.float32, -bound, bound)
    wv = jax.random.uniform(keys[5], (N_HEADS, HEAD_DIM, HIDDEN_DIM),
                            jnp.float32, -bound, bound)
    bv = jax.random.uniform(keys[6], (N_HEADS, 1, HEAD_DIM),
                            jnp.float32, -bound, bound)
    wo = jax.random.uniform(keys[7], (HIDDEN_DIM, HIDDEN_DIM),
                            jnp.float32, -bound, bound)
    bo = jax.random.uniform(keys[8], (1, HIDDEN_DIM),
                            jnp.float32, -bound, bound)

    masks = jnp.asarray(generate_masks(SEQ))

    # ---- host-side weight / constant prep ----
    # Per-head (hd, H) PyTorch weights -> column-stacked (H, H) per projection,
    # where columns [h*hd:(h+1)*hd] correspond to head h; fuse along lanes.
    wq_cat = jnp.transpose(wq, (2, 0, 1)).reshape(HIDDEN_DIM, HIDDEN_DIM)
    wk_cat = jnp.transpose(wk, (2, 0, 1)).reshape(HIDDEN_DIM, HIDDEN_DIM)
    wv_cat = jnp.transpose(wv, (2, 0, 1)).reshape(HIDDEN_DIM, HIDDEN_DIM)
    wqkv = jnp.concatenate([wq_cat, wk_cat, wv_cat], axis=1)        # (H, 3H)
    bqkv = jnp.concatenate([bq.reshape(-1), bk.reshape(-1),
                            bv.reshape(-1)]).reshape(1, 3 * HIDDEN_DIM)

    # Additive mask, head-packed on the lane axis: (S, N_HEADS*S) = (16, 128).
    mask_full = jnp.stack([masks[min(h, N_MASKS - 1)] for h in range(N_HEADS)])
    mask_add = (mask_full - 1.0) * NEG_BIG                          # 0 / -1e9
    mask_packed = jnp.transpose(mask_add, (1, 0, 2)).reshape(SEQ, PACKED)

    ksel_np, vsel_np, bones_np = build_selectors()
    ksel = jnp.asarray(ksel_np)
    vsel = jnp.asarray(vsel_np)
    bones_bf16 = jnp.asarray(bones_np).astype(jnp.bfloat16)

    # Block-diagonal output projection (one Wo^T block per batch element).
    wo_t = wo.T
    wobd = jnp.zeros((BATCH * HIDDEN_DIM, BATCH * HIDDEN_DIM), jnp.float32)
    for b in range(BATCH):
        wobd = wobd.at[b * HIDDEN_DIM:(b + 1) * HIDDEN_DIM,
                       b * HIDDEN_DIM:(b + 1) * HIDDEN_DIM].set(wo_t)
    bo2 = jnp.tile(bo, (1, BATCH))                                  # (1, B*H)

    # bf16 MXU operands (accumulation stays f32 inside the kernel).
    wqkv_bf16 = wqkv.astype(jnp.bfloat16)
    wobd_bf16 = wobd.astype(jnp.bfloat16)

    out = pyramidal_attention(x, wqkv_bf16, bqkv, mask_packed, ksel, vsel,
                              bones_bf16, wobd_bf16, bo2)
    out = jax.block_until_ready(out)

    ref = reference_forward(x, wq, bq, wk, bk, wv, bv, masks, wo, bo[0])
    # Tolerance sized for bf16 MXU inputs (f32 accumulation, f32 softmax).
    np.testing.assert_allclose(np.asarray(out), np.asarray(ref),
                               rtol=2e-2, atol=2e-2)

    print("KERNEL_OK")
</pallas_src>

<mosaic_0001>
module attributes {stable_mosaic.version = 11 : i64} {
  func.func @pyramidal_attn_kernel(%arg0: i32, %arg1: memref<32x64xf32, #tpu.memory_space<vmem>>, %arg2: memref<64x192xbf16, #tpu.memory_space<vmem>>, %arg3: memref<1x192xf32, #tpu.memory_space<vmem>>, %arg4: memref<16x128xf32, #tpu.memory_space<vmem>>, %arg5: memref<64x128xf32, #tpu.memory_space<vmem>>, %arg6: memref<128x64xf32, #tpu.memory_space<vmem>>, %arg7: memref<128x128xbf16, #tpu.memory_space<vmem>>, %arg8: memref<128x128xbf16, #tpu.memory_space<vmem>>, %arg9: memref<1x128xf32, #tpu.memory_space<vmem>>, %arg10: memref<16x128xf32, #tpu.memory_space<vmem>>) attributes {dimension_semantics = [#tpu.dimension_semantics<arbitrary>], iteration_bounds = array<i64: 1>, scalar_prefetch = 0 : i64, scratch_operands = 0 : i64, tpu.core_type = #tpu.core_type<tc>, window_params = [{pipeline_mode = #tpu.pipeline_mode<synchronous>, transform_indices = @transform_0, window_bounds = array<i64: 32, 64>}, {pipeline_mode = #tpu.pipeline_mode<synchronous>, transform_indices = @transform_1, window_bounds = array<i64: 64, 192>}, {pipeline_mode = #tpu.pipeline_mode<synchronous>, transform_indices = @transform_2, window_bounds = array<i64: 1, 192>}, {pipeline_mode = #tpu.pipeline_mode<synchronous>, transform_indices = @transform_3, window_bounds = array<i64: 16, 128>}, {pipeline_mode = #tpu.pipeline_mode<synchronous>, transform_indices = @transform_4, window_bounds = array<i64: 64, 128>}, {pipeline_mode = #tpu.pipeline_mode<synchronous>, transform_indices = @transform_5, window_bounds = array<i64: 128, 64>}, {pipeline_mode = #tpu.pipeline_mode<synchronous>, transform_indices = @transform_6, window_bounds = array<i64: 128, 128>}, {pipeline_mode = #tpu.pipeline_mode<synchronous>, transform_indices = @transform_7, window_bounds = array<i64: 128, 128>}, {pipeline_mode = #tpu.pipeline_mode<synchronous>, transform_indices = @transform_8, window_bounds = array<i64: 1, 128>}, {pipeline_mode = #tpu.pipeline_mode<synchronous>, transform_indices = @transform_9, window_bounds = array<i64: 16, 128>}]} {
    %c0 = arith.constant 0 : index
    %c0_0 = arith.constant 0 : index
    %0 = vector.load %arg1[%c0, %c0_0] : memref<32x64xf32, #tpu.memory_space<vmem>>, vector<32x64xf32>
    %1 = arith.truncf %0 : vector<32x64xf32> to vector<32x64xbf16>
    %c0_1 = arith.constant 0 : index
    %c0_2 = arith.constant 0 : index
    %2 = vector.load %arg2[%c0_1, %c0_2] : memref<64x192xbf16, #tpu.memory_space<vmem>>, vector<64x192xbf16>
    %cst = arith.constant dense<0.000000e+00> : vector<32x192xf32>
    %3 = tpu.matmul %1, %2, %cst {dimension_numbers = #tpu.dot_dimension_numbers<[1], [0], [0], [1], [0, 0, 1, 1], [], []>} : vector<32x64xbf16>, vector<64x192xbf16>, vector<32x192xf32> -> vector<32x192xf32>
    %c0_3 = arith.constant 0 : index
    %c0_4 = arith.constant 0 : index
    %4 = vector.load %arg3[%c0_3, %c0_4] : memref<1x192xf32, #tpu.memory_space<vmem>>, vector<1x192xf32>
    %5 = vector.broadcast %4 : vector<1x192xf32> to vector<32x192xf32>
    %6 = arith.addf %3, %5 : vector<32x192xf32>
    %c0_5 = arith.constant 0 : index
    %c0_6 = arith.constant 0 : index
    %7 = vector.load %arg4[%c0_5, %c0_6] : memref<16x128xf32, #tpu.memory_space<vmem>>, vector<16x128xf32>
    %c0_7 = arith.constant 0 : index
    %c0_8 = arith.constant 0 : index
    %8 = vector.load %arg5[%c0_7, %c0_8] : memref<64x128xf32, #tpu.memory_space<vmem>>, vector<64x128xf32>
    %c0_9 = arith.constant 0 : index
    %c0_10 = arith.constant 0 : index
    %9 = vector.load %arg6[%c0_9, %c0_10] : memref<128x64xf32, #tpu.memory_space<vmem>>, vector<128x64xf32>
    %10 = vector.extract_strided_slice %6 {offsets = [0, 0], sizes = [16, 64], strides = [1, 1]} : vector<32x192xf32> to vector<16x64xf32>
    %11 = vector.extract_strided_slice %6 {offsets = [0, 64], sizes = [16, 64], strides = [1, 1]} : vector<32x192xf32> to vector<16x64xf32>
    %12 = vector.extract_strided_slice %6 {offsets = [0, 128], sizes = [16, 64], strides = [1, 1]} : vector<32x192xf32> to vector<16x64xf32>
    %13 = tpu.transpose %11, [1, 0] : vector<16x64xf32> -> vector<64x16xf32>
    %14 = tpu.concatenate %13, %13, %13, %13, %13, %13, %13, %13 in 1 : vector<64x16xf32>, vector<64x16xf32>, vector<64x16xf32>, vector<64x16xf32>, vector<64x16xf32>, vector<64x16xf32>, vector<64x16xf32>, vector<64x16xf32> -> vector<64x128xf32>
    %15 = arith.mulf %14, %8 : vector<64x128xf32>
    %16 = arith.truncf %10 : vector<16x64xf32> to vector<16x64xbf16>
    %17 = arith.truncf %15 : vector<64x128xf32> to vector<64x128xbf16>
    %cst_11 = arith.constant dense<0.000000e+00> : vector<16x128xf32>
    %18 = tpu.matmul %16, %17, %cst_11 {dimension_numbers = #tpu.dot_dimension_numbers<[1], [0], [0], [1], [0, 0, 1, 1], [], []>} : vector<16x64xbf16>, vector<64x128xbf16>, vector<16x128xf32> -> vector<16x128xf32>
    %cst_12 = arith.constant 0.353553385 : f32
    %19 = vector.broadcast %cst_12 : f32 to vector<16x128xf32>
    %20 = arith.mulf %18, %19 : vector<16x128xf32>
    %21 = arith.addf %20, %7 : vector<16x128xf32>
    %cst_13 = arith.constant dense<0xFF800000> : vector<16xf32>
    %22 = vector.multi_reduction <maximumf>, %21, %cst_13 [1] : vector<16x128xf32> to vector<16xf32>
    %23 = vector.shape_cast %22 : vector<16xf32> to vector<16x1xf32>
    %24 = vector.broadcast %23 : vector<16x1xf32> to vector<16x128xf32>
    %25 = arith.subf %21, %24 : vector<16x128xf32>
    %26 = math.exp %25 : vector<16x128xf32>
    %27 = arith.truncf %26 : vector<16x128xf32> to vector<16x128xbf16>
    %c0_14 = arith.constant 0 : index
    %c0_15 = arith.constant 0 : index
    %28 = vector.load %arg7[%c0_14, %c0_15] : memref<128x128xbf16, #tpu.memory_space<vmem>>, vector<128x128xbf16>
    %cst_16 = arith.constant dense<0.000000e+00> : vector<16x128xf32>
    %29 = tpu.matmul %27, %28, %cst_16 {dimension_numbers = #tpu.dot_dimension_numbers<[1], [0], [0], [1], [0, 0, 1, 1], [], []>} : vector<16x128xbf16>, vector<128x128xbf16>, vector<16x128xf32> -> vector<16x128xf32>
    %30 = arith.divf %26, %29 : vector<16x128xf32>
    %31 = tpu.concatenate %12, %12, %12, %12, %12, %12, %12, %12 in 0 : vector<16x64xf32>, vector<16x64xf32>, vector<16x64xf32>, vector<16x64xf32>, vector<16x64xf32>, vector<16x64xf32>, vector<16x64xf32>, vector<16x64xf32> -> vector<128x64xf32>
    %32 = arith.mulf %31, %9 : vector<128x64xf32>
    %33 = arith.truncf %30 : vector<16x128xf32> to vector<16x128xbf16>
    %34 = arith.truncf %32 : vector<128x64xf32> to vector<128x64xbf16>
    %cst_17 = arith.constant dense<0.000000e+00> : vector<16x64xf32>
    %35 = tpu.matmul %33, %34, %cst_17 {dimension_numbers = #tpu.dot_dimension_numbers<[1], [0], [0], [1], [0, 0, 1, 1], [], []>} : vector<16x128xbf16>, vector<128x64xbf16>, vector<16x64xf32> -> vector<16x64xf32>
    %36 = vector.extract_strided_slice %6 {offsets = [16, 0], sizes = [16, 64], strides = [1, 1]} : vector<32x192xf32> to vector<16x64xf32>
    %37 = vector.extract_strided_slice %6 {offsets = [16, 64], sizes = [16, 64], strides = [1, 1]} : vector<32x192xf32> to vector<16x64xf32>
    %38 = vector.extract_strided_slice %6 {offsets = [16, 128], sizes = [16, 64], strides = [1, 1]} : vector<32x192xf32> to vector<16x64xf32>
    %39 = tpu.transpose %37, [1, 0] : vector<16x64xf32> -> vector<64x16xf32>
    %40 = tpu.concatenate %39, %39, %39, %39, %39, %39, %39, %39 in 1 : vector<64x16xf32>, vector<64x16xf32>, vector<64x16xf32>, vector<64x16xf32>, vector<64x16xf32>, vector<64x16xf32>, vector<64x16xf32>, vector<64x16xf32> -> vector<64x128xf32>
    %41 = arith.mulf %40, %8 : vector<64x128xf32>
    %42 = arith.truncf %36 : vector<16x64xf32> to vector<16x64xbf16>
    %43 = arith.truncf %41 : vector<64x128xf32> to vector<64x128xbf16>
    %cst_18 = arith.constant dense<0.000000e+00> : vector<16x128xf32>
    %44 = tpu.matmul %42, %43, %cst_18 {dimension_numbers = #tpu.dot_dimension_numbers<[1], [0], [0], [1], [0, 0, 1, 1], [], []>} : vector<16x64xbf16>, vector<64x128xbf16>, vector<16x128xf32> -> vector<16x128xf32>
    %cst_19 = arith.constant 0.353553385 : f32
    %45 = vector.broadcast %cst_19 : f32 to vector<16x128xf32>
    %46 = arith.mulf %44, %45 : vector<16x128xf32>
    %47 = arith.addf %46, %7 : vector<16x128xf32>
    %cst_20 = arith.constant dense<0xFF800000> : vector<16xf32>
    %48 = vector.multi_reduction <maximumf>, %47, %cst_20 [1] : vector<16x128xf32> to vector<16xf32>
    %49 = vector.shape_cast %48 : vector<16xf32> to vector<16x1xf32>
    %50 = vector.broadcast %49 : vector<16x1xf32> to vector<16x128xf32>
    %51 = arith.subf %47, %50 : vector<16x128xf32>
    %52 = math.exp %51 : vector<16x128xf32>
    %53 = arith.truncf %52 : vector<16x128xf32> to vector<16x128xbf16>
    %c0_21 = arith.constant 0 : index
    %c0_22 = arith.constant 0 : index
    %54 = vector.load %arg7[%c0_21, %c0_22] : memref<128x128xbf16, #tpu.memory_space<vmem>>, vector<128x128xbf16>
    %cst_23 = arith.constant dense<0.000000e+00> : vector<16x128xf32>
    %55 = tpu.matmul %53, %54, %cst_23 {dimension_numbers = #tpu.dot_dimension_numbers<[1], [0], [0], [1], [0, 0, 1, 1], [], []>} : vector<16x128xbf16>, vector<128x128xbf16>, vector<16x128xf32> -> vector<16x128xf32>
    %56 = arith.divf %52, %55 : vector<16x128xf32>
    %57 = tpu.concatenate %38, %38, %38, %38, %38, %38, %38, %38 in 0 : vector<16x64xf32>, vector<16x64xf32>, vector<16x64xf32>, vector<16x64xf32>, vector<16x64xf32>, vector<16x64xf32>, vector<16x64xf32>, vector<16x64xf32> -> vector<128x64xf32>
    %58 = arith.mulf %57, %9 : vector<128x64xf32>
    %59 = arith.truncf %56 : vector<16x128xf32> to vector<16x128xbf16>
    %60 = arith.truncf %58 : vector<128x64xf32> to vector<128x64xbf16>
    %cst_24 = arith.constant dense<0.000000e+00> : vector<16x64xf32>
    %61 = tpu.matmul %59, %60, %cst_24 {dimension_numbers = #tpu.dot_dimension_numbers<[1], [0], [0], [1], [0, 0, 1, 1], [], []>} : vector<16x128xbf16>, vector<128x64xbf16>, vector<16x64xf32> -> vector<16x64xf32>
    %62 = tpu.concatenate %35, %61 in 1 : vector<16x64xf32>, vector<16x64xf32> -> vector<16x128xf32>
    %63 = arith.truncf %62 : vector<16x128xf32> to vector<16x128xbf16>
    %c0_25 = arith.constant 0 : index
    %c0_26 = arith.constant 0 : index
    %64 = vector.load %arg8[%c0_25, %c0_26] : memref<128x128xbf16, #tpu.memory_space<vmem>>, vector<128x128xbf16>
    %cst_27 = arith.constant dense<0.000000e+00> : vector<16x128xf32>
    %65 = tpu.matmul %63, %64, %cst_27 {dimension_numbers = #tpu.dot_dimension_numbers<[1], [0], [0], [1], [0, 0, 1, 1], [], []>} : vector<16x128xbf16>, vector<128x128xbf16>, vector<16x128xf32> -> vector<16x128xf32>
    %c0_28 = arith.constant 0 : index
    %c0_29 = arith.constant 0 : index
    %66 = vector.load %arg9[%c0_28, %c0_29] : memref<1x128xf32, #tpu.memory_space<vmem>>, vector<1x128xf32>
    %67 = vector.broadcast %66 : vector<1x128xf32> to vector<16x128xf32>
    %68 = arith.addf %65, %67 : vector<16x128xf32>
    %c0_30 = arith.constant 0 : index
    %c0_31 = arith.constant 0 : index
    %69 = vector.load %arg10[%c0_30, %c0_31] : memref<16x128xf32, #tpu.memory_space<vmem>>, vector<16x128xf32>
    tpu.vector_store %arg10[%c0_30, %c0_31], %68 {strides = array<i32>} : memref<16x128xf32, #tpu.memory_space<vmem>>, vector<16x128xf32>,
    return
  }
  func.func @transform_0(%arg0: i32) -> (i32, i32) {
    %c0_i32 = arith.constant 0 : i32
    %c0_i32_0 = arith.constant 0 : i32
    %c0_i32_1 = arith.constant 0 : i32
    return %c0_i32, %c0_i32_0 : i32, i32
  }
  func.func @transform_1(%arg0: i32) -> (i32, i32) {
    %c0_i32 = arith.constant 0 : i32
    %c0_i32_0 = arith.constant 0 : i32
    %c0_i32_1 = arith.constant 0 : i32
    return %c0_i32, %c0_i32_0 : i32, i32
  }
  func.func @transform_2(%arg0: i32) -> (i32, i32) {
    %c0_i32 = arith.constant 0 : i32
    %c0_i32_0 = arith.constant 0 : i32
    %c0_i32_1 = arith.constant 0 : i32
    return %c0_i32, %c0_i32_0 : i32, i32
  }
  func.func @transform_3(%arg0: i32) -> (i32, i32) {
    %c0_i32 = arith.constant 0 : i32
    %c0_i32_0 = arith.constant 0 : i32
    %c0_i32_1 = arith.constant 0 : i32
    return %c0_i32, %c0_i32_0 : i32, i32
  }
  func.func @transform_4(%arg0: i32) -> (i32, i32) {
    %c0_i32 = arith.constant 0 : i32
    %c0_i32_0 = arith.constant 0 : i32
    %c0_i32_1 = arith.constant 0 : i32
    return %c0_i32, %c0_i32_0 : i32, i32
  }
  func.func @transform_5(%arg0: i32) -> (i32, i32) {
    %c0_i32 = arith.constant 0 : i32
    %c0_i32_0 = arith.constant 0 : i32
    %c0_i32_1 = arith.constant 0 : i32
    return %c0_i32, %c0_i32_0 : i32, i32
  }
  func.func @transform_6(%arg0: i32) -> (i32, i32) {
    %c0_i32 = arith.constant 0 : i32
    %c0_i32_0 = arith.constant 0 : i32
    %c0_i32_1 = arith.constant 0 : i32
    return %c0_i32, %c0_i32_0 : i32, i32
  }
  func.func @transform_7(%arg0: i32) -> (i32, i32) {
    %c0_i32 = arith.constant 0 : i32
    %c0_i32_0 = arith.constant 0 : i32
    %c0_i32_1 = arith.constant 0 : i32
    return %c0_i32, %c0_i32_0 : i32, i32
  }
  func.func @transform_8(%arg0: i32) -> (i32, i32) {
    %c0_i32 = arith.constant 0 : i32
    %c0_i32_0 = arith.constant 0 : i32
    %c0_i32_1 = arith.constant 0 : i32
    return %c0_i32, %c0_i32_0 : i32, i32
  }
  func.func @transform_9(%arg0: i32) -> (i32, i32) {
    %c0_i32 = arith.constant 0 : i32
    %c0_i32_0 = arith.constant 0 : i32
    %c0_i32_1 = arith.constant 0 : i32
    return %c0_i32, %c0_i32_0 : i32, i32
  }
}

</mosaic_0001>

<bundles_post_ra>
// kernel: tpu_custom_call.1
= control target key start
LH: loop header
LB: loop body
LE: loop exit
PB: predicated region body
PF: predicated region fallthrough
CT: control target
= control target key end

     0   :  { %14 = vsyncpa [#allocation3], 0  ;;  %s2783_s0 = inlined_call_operand.hbm [shape: f32[32,64], index: 0, kind: input, shape index: {}]   ;;  %s2784_s1 = inlined_call_operand.vmem [shape: bf16[64,192], index: 1, kind: input, shape index: {}]   ;;  %s2785_s2 = inlined_call_operand.vmem [shape: f32[1,192], index: 2, kind: input, shape index: {}]   ;;  %s2786_s3 = inlined_call_operand.hbm [shape: f32[16,128], index: 3, kind: input, shape index: {}]   ;;  %s2787_s4 = inlined_call_operand.vmem [shape: f32[64,128], index: 4, kind: input, shape index: {}]   ;;  %s2788_s5 = inlined_call_operand.vmem [shape: f32[128,64], index: 5, kind: input, shape index: {}]   ;;  %s2789_s6 = inlined_call_operand.vmem [shape: bf16[128,128], index: 6, kind: input, shape index: {}]   ;;  %s2790_s7 = inlined_call_operand.hbm [shape: bf16[128,128], index: 7, kind: input, shape index: {}]   ;;  %s2791_s8 = inlined_call_operand.vmem [shape: f32[1,128], index: 8, kind: input, shape index: {}]   ;;  %s2792_s9 = inlined_call_operand.hbm [shape: f32[16,128], index: 9, kind: output, shape index: {}]  }
   0x1   :  { %15 = vsyncpa [#allocation6], 0 }
   0x2   :  { %16 = vsyncpa [#allocation4], 0  ;;  %s1718_s30 = smov [#allocation5]   ;;  %s1719_s11 = smov [#allocation2]  }
   0x3   :  { %s38_s10 = sshll.u32 %s1718_s30, 4  ;;  %s22_s12 = sshll.u32 %s1719_s11, 4  ;;  %s39_s10 = int_to_ptr.vmem [resolvable:$true] %s38_s10  ;;  %s1785_s12 = int_to_ptr.vmem [resolvable:$true] %s22_s12 }
   0x4   :  { %s1624_s15 = scalar_lea.hbm %s2786_s3, 256 }
   0x5   :  { %p1625_p0 = scmp.ne.s32.totalorder %s2786_s3, %s1624_s15  ;;  %p1628_p1 = scmp.lt.u32.totalorder %s1624_s15, %s2786_s3 }
   0x7   :  { %p1630_p2 = pnand %p1628_p1, %p1625_p0 }
   0x9   :  { %1633 = shalt.err (!%p1630_p2)
}
   0xa   :  { %s1634_s20 = scalar_lea.vmem %s39_s10, 256  ;;  %p1639_p4 = scmp.lt.s32.totalorder %s39_s10, %s39_s10 }
   0xb   :  { %p1635_p3 = scmp.ne.s32.totalorder %s39_s10, %s1634_s20  ;;  %p1640_p5 = scmp.lt.s32.totalorder %s1634_s20, %s1634_s20 }
   0xd   :  { %p1641_p6 = por %p1640_p5, %p1639_p4 }
   0xf   :  { %p1642_p7 = pnand %p1641_p6, %p1635_p3 }
  0x11   :  { %1645 = shalt.err (!%p1642_p7)
}
  0x12   :  { %s1720_s21 = smov 128   ;;  %s1721_s22 = smov 8  }
  0x13   :  { %44 = dma.hbm_to_vmem [thread:$0]  %s2786_s3, 256, %s39_s10, [#allocation6], %s1720_s21, %s1720_s21, %s1721_s22  }
  0x14   :  { %s1646_s27 = scalar_lea.hbm %s2783_s0, 512 }
  0x15   :  { %p1647_p8 = scmp.ne.s32.totalorder %s2783_s0, %s1646_s27  ;;  %p1650_p9 = scmp.lt.u32.totalorder %s1646_s27, %s2783_s0 }
  0x17   :  { %p1652_p10 = pnand %p1650_p9, %p1647_p8 }
  0x19   :  { %1655 = shalt.err (!%p1652_p10)
}
  0x1a   :  { %s1656_s13 = scalar_lea.vmem %s1785_s12, 512  ;;  %p1661_p12 = scmp.lt.s32.totalorder %s1785_s12, %s1785_s12 }
  0x1b   :  { %p1657_p11 = scmp.ne.s32.totalorder %s1785_s12, %s1656_s13  ;;  %p1662_p13 = scmp.lt.s32.totalorder %s1656_s13, %s1656_s13 }
  0x1d   :  { %p1663_p0 = por %p1662_p13, %p1661_p12 }
  0x1f   :  { %p1664_p1 = pnand %p1663_p0, %p1657_p11 }
  0x21   :  { %1667 = shalt.err (!%p1664_p1)
}
  0x22   :  { %28 = dma.hbm_to_vmem [thread:$0]  %s2783_s0, 512, %s1785_s12, [#allocation3], %s1720_s21, %s1720_s21, %s1721_s22  }
  0x23   :  { %s1722_s14 = smov [#allocation7]   ;;  %s1668_s18 = scalar_lea.hbm %s2790_s7, 1024 }
  0x24   :  { %s56_s15 = sshll.u32 %s1722_s14, 4  ;;  %p1669_p2 = scmp.ne.s32.totalorder %s2790_s7, %s1668_s18  ;;  %s57_s15 = int_to_ptr.vmem [resolvable:$true] %s56_s15 }
  0x25   :  { %p1672_p3 = scmp.lt.u32.totalorder %s1668_s18, %s2790_s7 }
  0x27   :  { %p1674_p4 = pnand %p1672_p3, %p1669_p2 }
  0x29   :  { %1677 = shalt.err (!%p1674_p4)
}
  0x2a   :  { %s1678_s25 = scalar_lea.vmem %s57_s15, 1024  ;;  %p1683_p6 = scmp.lt.s32.totalorder %s57_s15, %s57_s15 }
  0x2b   :  { %p1679_p5 = scmp.ne.s32.totalorder %s57_s15, %s1678_s25  ;;  %p1684_p7 = scmp.lt.s32.totalorder %s1678_s25, %s1678_s25 }
  0x2d   :  { %p1685_p8 = por %p1684_p7, %p1683_p6 }
  0x2f   :  { %p1686_p9 = pnand %p1685_p8, %p1679_p5 }
  0x31   :  { %1689 = shalt.err (!%p1686_p9)
}
  0x32   :  { %s1723_s0 = smov 64   ;;  %s1724_s12 = smov 4  }
  0x33   :  { %62 = dma.hbm_to_vmem [thread:$0]  %s2790_s7, 1024, %s57_s15, [#allocation6], %s1723_s0, %s1723_s0, %s1724_s12  }
  0x34   :  { %1712 = dma.done.wait [#allocation3], 512  }
  0x35   :  { %1713 = vsyncadd [#allocation3], 4294966784 }
  0x36   :  { %1714 = dma.done.wait [#allocation6], 1280  }
  0x37   :  { %1715 = vsyncadd [#allocation6], 4294966016  ;;  %v1725_v0 = vmov 0   ;;  %v1580_v1 = vld [vmem:[%s2784_s1 + $0x4] ss:$8 sps:$4 sm:$0xff]   ;;  %vm141_vm0 = vcmask 523264   ;;  %v91_v12 = vlaneseq }
  0x38   :  { %180 = vmatprep.mubr.bf16.mxu0 %v1725_v0  ;;  %v1582_v2 = vld [vmem:[%s2784_s1] ss:$8 sps:$4 sm:$0xff]   ;;  %148 = vmatprep.subr.bf16.mxu0 %v1580_v1  ;;  %v1583_v3 = vld [vmem:[%s2784_s1 + $0x14] ss:$8 sps:$4 sm:$0xff]   ;;  %v1585_v4 = vld [vmem:[%s2784_s1 + $0x10] ss:$8 sps:$4 sm:$0xff]  }
  0x39   :  { %149 = vmatpush1.bf16.msra.mxu0 %v1582_v2  ;;  %v1586_v5 = vld [vmem:[%s2784_s1 + $0x24] ss:$8 sps:$4 sm:$0xff]   ;;  %v1588_v6 = vld [vmem:[%s2784_s1 + $0x20] ss:$8 sps:$4 sm:$0xff]   ;;  %v1589_v7 = vld [vmem:[%s2784_s1 + $0x34] ss:$8 sps:$4 sm:$0xff]  }
  0x3a   :  { %150 = vmatprep.subr.bf16.mxu0 %v1583_v3  ;;  %v1591_v8 = vld [vmem:[%s2784_s1 + $0x30] ss:$8 sps:$4 sm:$0xff]   ;;  %v75_v9 = vld [vmem:[#allocation2] sm:$0xff]  ;;  %v76_v10 = vld [vmem:[#allocation2 + $0x8] sm:$0xff]  ;;  %v92_v13 = vshrl.u32 %v91_v12, 7  ;;  %s1727_s13 = smov 32  }
  0x3b   :  { %v79_v11 = vpack.c.bf16 %v76_v10, %v75_v9  ;;  %v89_v15 = vld [vmem:[%s2785_s2] sm:$0x3]  ;;  %v77_v17 = vld [vmem:[#allocation2 + $0x10] sm:$0xff]  ;;  %v78_v18 = vld [vmem:[#allocation2 + $0x18] sm:$0xff]  ;;  %s1728_s3 = smov 48   ;;  %s1729_s7 = smov 96  }
  0x3c   :  { %v93_v14 = vsub.s32 0, %v92_v13  ;;  %v97_v16 = vsub.s32 1, %v92_v13  ;;  %v80_v19 = vpack.c.bf16 %v78_v18, %v77_v17  ;;  %v1872_v23 = vld [vmem:[%s2788_s5] sm:$0xff]  ;;  %v1877_v24 = vld [vmem:[%s2788_s5 + $0x10] sm:$0xff]  ;;  %v1901_v32 = vld [vmem:[%s2788_s5 + $0x8] sm:$0xff]  ;;  %s1730_s10 = smov 112  }
  0x3d   :  { %151 = vmatpush1.bf16.msra.mxu0 %v1585_v4  ;;  %v1885_v27 = vld [vmem:[%s2788_s5 + $0x20] sm:$0xff]  ;;  %v1890_v28 = vld [vmem:[%s2788_s5 + $0x30] sm:$0xff]  ;;  %v1906_v33 = vld [vmem:[%s2788_s5 + $0x18] sm:$0xff]  ;;  %s1731_s14 = smov 80   ;;  %vm1733_vm1 = vmmov 0   ;;  %vm443_vm2 = vcmask 130048  }
  0x3e   :  { %152 = vmatprep.subr.bf16.mxu0 %v1586_v5  ;;  %v1864_v20 = vrot.slane %v89_v15, %v93_v14  ;;  %v1867_v21 = vrot.slane %v89_v15, %v97_v16  ;;  %v1895_v29 = vld [vmem:[%s2788_s5 + $0x40] sm:$0xff]  ;;  %v1911_v34 = vld [vmem:[%s2788_s5 + $0x50] sm:$0xff]  ;;  %v1921_v37 = vld [vmem:[%s2788_s5 + $0x28] sm:$0xff]  ;;  %vm452_vm3 = vcmask 261120   ;;  %vm461_vm4 = vcmask 392192   ;;  %s1734_s25 = smov [#allocation8]  }
  0x3f   :  { %v1926_v38 = vld [vmem:[%s2788_s5 + $0x38] sm:$0xff]  ;;  %v1931_v39 = vld [vmem:[%s2788_s5 + $0x48] sm:$0xff]  ;;  %v1951_v45 = vld [vmem:[%s2788_s5 + $0x60] sm:$0xff]  ;;  %vm478_vm5 = vcmask 654336   ;;  %vm487_vm6 = vcmask 785408   ;;  %vm496_vm7 = vcmask 916480  }
  0x40   :  { %v1946_v44 = vld [vmem:[%s2788_s5 + $0x58] sm:$0xff]  ;;  %v1956_v46 = vld [vmem:[%s2788_s5 + $0x68] sm:$0xff]  ;;  %v225_v59 = vld [vmem:[%s2788_s5 + $0x70] sm:$0xff]  ;;  %s1337_s1 = sshll.u32 %s1734_s25, 4  ;;  %s1338_s1 = int_to_ptr.vmem [resolvable:$true] %s1337_s1 }
  0x41   :  { %153 = vmatpush1.bf16.msra.mxu0 %v1588_v6  ;;  %v226_v60 = vld [vmem:[%s2788_s5 + $0x78] sm:$0xff]  ;;  %s1726_s5 = smov 16   ;;  %p1695_p11 = scmp.lt.s32.totalorder %s1338_s1, %s1338_s1 }
  0x42   :  { %154 = vmatprep.subr.bf16.mxu0 %v1589_v7 }
  0x45   :  { %155 = vmatpush1.bf16.msra.mxu0 %v1591_v8 }
  0x48   :  { %1358 = vmatmul.mubr.msk.bf16.vlgmr.msra.gmra.mrb[0].mxu0 %vm141_vm0, %v79_v11 }
  0x49   :  { %190 = vmatprep.mubr.bf16.mxu0 %v1725_v0 }
  0x50   :  { %1359 = vmatmul.mubr.msk.bf16.gmra.mrb[4].mxu0 %vm141_vm0, %v80_v19 }
 0x11b   :  { %v182_v22 = vpop.f32.mrb[0].mxu0 }
 0x11c   :  { %v1880_v25 = vadd.f32 %v182_v22, %v1864_v20  ;;  %v184_v26 = vpop.f32.mrb[1].mxu0 }
 0x11d   :  { %v185_v30 = vadd.f32 %v184_v26, %v1867_v21  ;;  %v186_v31 = vpop.f32.mrb[2].mxu0 }
 0x11e   :  { %v1914_v35 = vadd.f32 %v186_v31, %v1864_v20  ;;  %v188_v36 = vpop.f32.mrb[3].mxu0  ;;  %229 = vrot.lane.b32.xlu0 %v1880_v25, %s1723_s0 }
 0x11f   :  { %v189_v40 = vadd.f32 %v188_v36, %v1867_v21  ;;  %v1935_v41 = vmul.f32 %v1872_v23, %v185_v30  ;;  %v1938_v42 = vmul.f32 %v1877_v24, %v185_v30  ;;  %v1941_v43 = vmul.f32 %v1885_v27, %v185_v30 }
 0x120   :  { %v1961_v48 = vmul.f32 %v1890_v28, %v185_v30  ;;  %v1964_v49 = vmul.f32 %v1895_v29, %v185_v30  ;;  %v1967_v50 = vmul.f32 %v1911_v34, %v185_v30  ;;  %v1990_v57 = vmul.f32 %v1951_v45, %v185_v30 }
 0x121   :  { %v1970_v51 = vmul.f32 %v1901_v32, %v189_v40  ;;  %v1973_v52 = vmul.f32 %v1906_v33, %v189_v40  ;;  %v1976_v53 = vmul.f32 %v1921_v37, %v189_v40  ;;  %v1979_v54 = vmul.f32 %v1926_v38, %v189_v40 }
 0x122   :  { %231 = vrot.lane.b32.xlu0 %v1914_v35, %s1723_s0  ;;  %v1984_v55 = vmul.f32 %v1931_v39, %v189_v40  ;;  %v1987_v56 = vmul.f32 %v1946_v44, %v189_v40  ;;  %v1993_v58 = vmul.f32 %v1956_v46, %v189_v40  ;;  %v2015_v4 = vmul.f32 %v225_v59, %v185_v30 }
 0x123   :  { %v2017_v5 = vmul.f32 %v226_v60, %v189_v40  ;;  %v2025_v10 = vpop.f32.mrb[4].mxu0 }
 0x124   :  { %v194_v12 = vpop.f32.mrb[5].mxu0 }
 0x125   :  { %v2033_v13 = vpop.f32.mrb[6].mxu0  ;;  %v195_v16 = vadd.f32 %v194_v12, %v1867_v21 }
 0x126   :  { %v198_v14 = vpop.f32.mrb[7].mxu0 }
 0x127   :  { %v199_v17 = vadd.f32 %v198_v14, %v1867_v21  ;;  %v2050_v19 = vmul.f32 %v1872_v23, %v195_v16  ;;  %v2056_v26 = vmul.f32 %v1877_v24, %v195_v16  ;;  %v2062_v30 = vmul.f32 %v1885_v27, %v195_v16 }
 0x128   :  { %v2068_v36 = vmul.f32 %v1890_v28, %v195_v16  ;;  %v2100_v40 = vmul.f32 %v1951_v45, %v195_v16 }
 0x129   :  { %v2053_v22 = vmul.f32 %v1901_v32, %v199_v17  ;;  %v2059_v21 = vmul.f32 %v1906_v33, %v199_v17  ;;  %v2065_v31 = vmul.f32 %v1921_v37, %v199_v17  ;;  %v2071_v23 = vmul.f32 %v1926_v38, %v199_v17 }
 0x12a   :  { %2806 = vst [vmem:[#allocation12_spill] sm:$0xff] %v2068_v36  ;;  %v2078_v33 = vmul.f32 %v1895_v29, %v195_v16  ;;  %v2081_v27 = vmul.f32 %v1931_v39, %v199_v17  ;;  %v2092_v38 = vmul.f32 %v1911_v34, %v195_v16  ;;  %v2097_v39 = vmul.f32 %v1946_v44, %v199_v17 }
 0x12b   :  { %2811 = vst [vmem:[#allocation17_spill] sm:$0xff] %v2100_v40  ;;  %v2107_v12 = vmul.f32 %v226_v60, %v199_v17  ;;  %v2229_v32 = vadd.f32 %v2025_v10, %v1864_v20 }
 0x12c   :  { %2807 = vst [vmem:[#allocation13_spill] sm:$0xff] %v2078_v33  ;;  %2808 = vst [vmem:[#allocation14_spill] sm:$0xff] %v2081_v27 }
 0x12d   :  { %2809 = vst [vmem:[#allocation15_spill] sm:$0xff] %v2092_v38  ;;  %2810 = vst [vmem:[#allocation16_spill] sm:$0xff] %v2097_v39 }
 0x12e   :  { %2814 = vst [vmem:[#allocation20_spill] sm:$0xff] %v2107_v12 }
 0x190   :  { %v230_v7 = vpop.permute.xlu0 %229 }
 0x191   :  { %235 = vxpose.xlu1.b32.start [1/2] (short) (narrow) %v230_v7, 64  ;;  %v2103_v7 = vmul.f32 %v1956_v46, %v199_v17  ;;  %v2199_v17 = vadd.f32 %v2033_v13, %v1864_v20 }
 0x193   :  { %2812 = vst [vmem:[#allocation18_spill] sm:$0xff] %v2103_v7 }
 0x194   :  { %v232_v8 = vpop.permute.xlu0 %231 }
 0x195   :  { %236 = vxpose.xlu1.b32.end [2/2] (short) (narrow) %v232_v8, 64  ;;  %v2105_v8 = vmul.f32 %v225_v59, %v195_v16  ;;  %v2793_v59 = vmov 0.0  }
 0x196   :  { %1434 = vmatprep.subr.bf16.mxu1 %v2793_v59  ;;  %1446 = vmatprep.subr.bf16.mxu0 %v2793_v59 }
 0x197   :  { %2813 = vst [vmem:[#allocation19_spill] sm:$0xff] %v2105_v8  ;;  %1442 = vmatprep.mubr.msk.bf16.mxu1 %vm1733_vm1, %v2793_v59  ;;  %1462 = vmatprep.mubr.msk.bf16.mxu0 %vm1733_vm1, %v2793_v59 }
 0x211   :  { %v2021_v9 = vpop.trf.xlu1 }
 0x212   :  { %275 = vrot.lane.b32.xlu0 %v2021_v9, %s1726_s5 }
 0x215   :  { %v2027_v11 = vpop.trf.xlu1 }
 0x216   :  { %299 = vrot.lane.b32.xlu0 %v2021_v9, %s1727_s13  ;;  %277 = vrot.lane.b32.xlu1 %v2027_v11, %s1726_s5 }
 0x219   :  { %v2035_v15 = vpop.trf.xlu1 }
 0x21a   :  { %323 = vrot.lane.b32.xlu0 %v2021_v9, %s1728_s3  ;;  %397 = vrot.lane.b32.xlu1 %v2027_v11, %s1729_s7 }
 0x21d   :  { %v2047_v18 = vpop.trf.xlu1 }
 0x21e   :  { %347 = vrot.lane.b32.xlu0 %v2021_v9, %s1723_s0  ;;  %421 = vrot.lane.b32.xlu1 %v2027_v11, %s1730_s10 }
 0x221   :  { %v2123_v45 = vpop.trf.xlu1 }
 0x222   :  { %371 = vrot.lane.b32.xlu0 %v2021_v9, %s1731_s14  ;;  %329 = vrot.lane.b32.xlu1 %v2047_v18, %s1728_s3 }
 0x225   :  { %v2133_v46 = vpop.trf.xlu1 }
 0x226   :  { %395 = vrot.lane.b32.xlu0 %v2021_v9, %s1729_s7  ;;  %353 = vrot.lane.b32.xlu1 %v2047_v18, %s1723_s0 }
 0x229   :  { %v2157_v60 = vpop.trf.xlu1 }
 0x22a   :  { %419 = vrot.lane.b32.xlu0 %v2021_v9, %s1730_s10  ;;  %377 = vrot.lane.b32.xlu1 %v2047_v18, %s1731_s14 }
 0x22d   :  { %v2167_v16 = vpop.trf.xlu1 }
 0x22e   :  { %301 = vrot.lane.b32.xlu0 %v2027_v11, %s1727_s13  ;;  %401 = vrot.lane.b32.xlu1 %v2047_v18, %s1729_s7 }
 0x232   :  { %325 = vrot.lane.b32.xlu0 %v2027_v11, %s1728_s3  ;;  %425 = vrot.lane.b32.xlu1 %v2047_v18, %s1730_s10 }
 0x236   :  { %349 = vrot.lane.b32.xlu0 %v2027_v11, %s1723_s0  ;;  %285 = vrot.lane.b32.xlu1 %v2133_v46, %s1726_s5 }
 0x23a   :  { %373 = vrot.lane.b32.xlu0 %v2027_v11, %s1731_s14  ;;  %309 = vrot.lane.b32.xlu1 %v2133_v46, %s1727_s13 }
 0x23e   :  { %279 = vrot.lane.b32.xlu0 %v2035_v15, %s1726_s5  ;;  %333 = vrot.lane.b32.xlu1 %v2133_v46, %s1728_s3 }
 0x242   :  { %303 = vrot.lane.b32.xlu0 %v2035_v15, %s1727_s13  ;;  %357 = vrot.lane.b32.xlu1 %v2133_v46, %s1723_s0 }
 0x246   :  { %327 = vrot.lane.b32.xlu0 %v2035_v15, %s1728_s3  ;;  %381 = vrot.lane.b32.xlu1 %v2133_v46, %s1731_s14 }
 0x24a   :  { %351 = vrot.lane.b32.xlu0 %v2035_v15, %s1723_s0  ;;  %405 = vrot.lane.b32.xlu1 %v2133_v46, %s1729_s7 }
 0x24e   :  { %375 = vrot.lane.b32.xlu0 %v2035_v15, %s1731_s14  ;;  %429 = vrot.lane.b32.xlu1 %v2133_v46, %s1730_s10 }
 0x252   :  { %399 = vrot.lane.b32.xlu0 %v2035_v15, %s1729_s7  ;;  %289 = vrot.lane.b32.xlu1 %v2167_v16, %s1726_s5 }
 0x256   :  { %423 = vrot.lane.b32.xlu0 %v2035_v15, %s1730_s10  ;;  %313 = vrot.lane.b32.xlu1 %v2167_v16, %s1727_s13 }
 0x25a   :  { %281 = vrot.lane.b32.xlu0 %v2047_v18, %s1726_s5  ;;  %337 = vrot.lane.b32.xlu1 %v2167_v16, %s1728_s3 }
 0x25e   :  { %305 = vrot.lane.b32.xlu0 %v2047_v18, %s1727_s13  ;;  %361 = vrot.lane.b32.xlu1 %v2167_v16, %s1723_s0 }
 0x262   :  { %283 = vrot.lane.b32.xlu0 %v2123_v45, %s1726_s5  ;;  %385 = vrot.lane.b32.xlu1 %v2167_v16, %s1731_s14 }
 0x266   :  { %307 = vrot.lane.b32.xlu0 %v2123_v45, %s1727_s13  ;;  %409 = vrot.lane.b32.xlu1 %v2167_v16, %s1729_s7 }
 0x26a   :  { %331 = vrot.lane.b32.xlu0 %v2123_v45, %s1728_s3  ;;  %433 = vrot.lane.b32.xlu1 %v2167_v16, %s1730_s10 }
 0x26e   :  { %355 = vrot.lane.b32.xlu0 %v2123_v45, %s1723_s0  ;;  %756 = vrot.lane.b32.xlu1 %v2199_v17, %s1723_s0 }
 0x272   :  { %379 = vrot.lane.b32.xlu0 %v2123_v45, %s1731_s14 }
 0x276   :  { %403 = vrot.lane.b32.xlu0 %v2123_v45, %s1729_s7 }
 0x27a   :  { %427 = vrot.lane.b32.xlu0 %v2123_v45, %s1730_s10 }
 0x27e   :  { %287 = vrot.lane.b32.xlu0 %v2157_v60, %s1726_s5 }
 0x282   :  { %311 = vrot.lane.b32.xlu0 %v2157_v60, %s1727_s13 }
 0x284   :  { %v276_v13 = vpop.permute.xlu0 %275 }
 0x285   :  { %v444_v20 = vsel %vm443_vm2, %v2021_v9, %v276_v13 }
 0x286   :  { %335 = vrot.lane.b32.xlu0 %v2157_v60, %s1728_s3 }
 0x288   :  { %v300_v44 = vpop.permute.xlu0 %299  ;;  %v278_v14 = vpop.permute.xlu1 %277 }
 0x289   :  { %v453_v10 = vsel %vm452_vm3, %v444_v20, %v300_v44  ;;  %v445_v47 = vsel %vm443_vm2, %v2027_v11, %v278_v14  ;;  %v2250_v11 = vld [vmem:[%s2787_s4] sm:$0xff] }
 0x28a   :  { %359 = vrot.lane.b32.xlu0 %v2157_v60, %s1723_s0 }
 0x28c   :  { %v324_v34 = vpop.permute.xlu0 %323  ;;  %v398_v29 = vpop.permute.xlu1 %397 }
 0x28d   :  { %v462_v59 = vsel %vm461_vm4, %v453_v10, %v324_v34 }
 0x28e   :  { %383 = vrot.lane.b32.xlu0 %v2157_v60, %s1731_s14 }
 0x290   :  { %v348_v37 = vpop.permute.xlu0 %347  ;;  %v422_v28 = vpop.permute.xlu1 %421 }
 0x291   :  { %v470_v8 = vsel %vm141_vm0, %v462_v59, %v348_v37 }
 0x292   :  { %407 = vrot.lane.b32.xlu0 %v2157_v60, %s1729_s7 }
 0x294   :  { %v372_v24 = vpop.permute.xlu0 %371  ;;  %v330_v6 = vpop.permute.xlu1 %329 }
 0x295   :  { %v479_v7 = vsel %vm478_vm5, %v470_v8, %v372_v24 }
 0x296   :  { %431 = vrot.lane.b32.xlu0 %v2157_v60, %s1730_s10 }
 0x298   :  { %v396_v3 = vpop.permute.xlu0 %395  ;;  %v354_v1 = vpop.permute.xlu1 %353 }
 0x299   :  { %v488_v44 = vsel %vm487_vm6, %v479_v7, %v396_v3 }
 0x29a   :  { %754 = vrot.lane.b32.xlu0 %v2229_v32, %s1723_s0 }
 0x29c   :  { %v420_v2 = vpop.permute.xlu0 %419  ;;  %v378_v63 = vpop.permute.xlu1 %377 }
 0x29d   :  { %v497_v37 = vsel %vm496_vm7, %v488_v44, %v420_v2  ;;  %v2815_v2 = vmov 0.0  }
 0x2a0   :  { %v302_v0 = vpop.permute.xlu0 %301  ;;  %v402_v40 = vpop.permute.xlu1 %401 }
 0x2a1   :  { %v454_v12 = vsel %vm452_vm3, %v445_v47, %v302_v0  ;;  %v2257_v47 = vld [vmem:[%s2787_s4 + $0x8] sm:$0xff] }
 0x2a4   :  { %v326_v62 = vpop.permute.xlu0 %325  ;;  %v426_v3 = vpop.permute.xlu1 %425 }
 0x2a5   :  { %v463_v9 = vsel %vm461_vm4, %v454_v12, %v326_v62 }
 0x2a8   :  { %v350_v61 = vpop.permute.xlu0 %349  ;;  %v286_v14 = vpop.permute.xlu1 %285 }
 0x2a9   :  { %v471_v13 = vsel %vm141_vm0, %v463_v9, %v350_v61  ;;  %v505_v61 = vmul.f32 %v497_v37, %v2250_v11 }
 0x2ac   :  { %v374_v20 = vpop.permute.xlu0 %373  ;;  %v310_v10 = vpop.permute.xlu1 %309 }
 0x2ad   :  { %v480_v34 = vsel %vm478_vm5, %v471_v13, %v374_v20 }
 0x2ae   :  { %v489_v62 = vsel %vm487_vm6, %v480_v34, %v398_v29 }
 0x2af   :  { %v498_v0 = vsel %vm496_vm7, %v489_v62, %v422_v28 }
 0x2b0   :  { %v280_v24 = vpop.permute.xlu0 %279  ;;  %v506_v7 = vmul.f32 %v498_v0, %v2257_v47  ;;  %v334_v13 = vpop.permute.xlu1 %333 }
 0x2b1   :  { %v446_v37 = vsel %vm443_vm2, %v2035_v15, %v280_v24 }
 0x2b2   :  { %v514_v8 = vpack.c.bf16 %v506_v7, %v505_v61 }
 0x2b4   :  { %v304_v12 = vpop.permute.xlu0 %303  ;;  %1435 = vmatpush3.bf16.msra.mxu1 %v514_v8  ;;  %v358_v20 = vpop.permute.xlu1 %357 }
 0x2b5   :  { %1436 = vmatprep.subr.bf16.mxu1 %v2815_v2  ;;  %v455_v0 = vsel %vm452_vm3, %v446_v37, %v304_v12  ;;  %v2279_v12 = vld [vmem:[%s2787_s4 + $0x10] sm:$0xff]  ;;  %v449_v37 = vsel %vm443_vm2, %v2133_v46, %v286_v14  ;;  %v2308_v14 = vld [vmem:[%s2787_s4 + $0x28] sm:$0xff] }
 0x2b8   :  { %v328_v59 = vpop.permute.xlu0 %327  ;;  %v382_v62 = vpop.permute.xlu1 %381 }
 0x2b9   :  { %v464_v61 = vsel %vm461_vm4, %v455_v0, %v328_v59 }
 0x2bc   :  { %v352_v9 = vpop.permute.xlu0 %351  ;;  %v406_v24 = vpop.permute.xlu1 %405 }
 0x2bd   :  { %v472_v38 = vsel %vm141_vm0, %v464_v61, %v352_v9 }
 0x2c0   :  { %v376_v44 = vpop.permute.xlu0 %375 }
 0x2c1   :  { %v481_v33 = vsel %vm478_vm5, %v472_v38, %v376_v44  ;;  %v2286_v38 = vld [vmem:[%s2787_s4 + $0x18] sm:$0xff] }
 0x2c4   :  { %v400_v29 = vpop.permute.xlu0 %399 }
 0x2c5   :  { %v490_v36 = vsel %vm487_vm6, %v481_v33, %v400_v29  ;;  %v430_v29 = vpop.permute.xlu1 %429 }
 0x2c8   :  { %v424_v28 = vpop.permute.xlu0 %423 }
 0x2cc   :  { %v282_v34 = vpop.permute.xlu0 %281 }
 0x2cd   :  { %v447_v7 = vsel %vm443_vm2, %v2047_v18, %v282_v34  ;;  %v499_v18 = vsel %vm496_vm7, %v490_v36, %v424_v28 }
 0x2ce   :  { %v507_v33 = vmul.f32 %v499_v18, %v2279_v12 }
 0x2d0   :  { %v306_v8 = vpop.permute.xlu0 %305 }
 0x2d1   :  { %v456_v39 = vsel %vm452_vm3, %v447_v7, %v306_v8 }
 0x2d2   :  { %v465_v27 = vsel %vm461_vm4, %v456_v39, %v330_v6 }
 0x2d3   :  { %v473_v15 = vsel %vm141_vm0, %v465_v27, %v354_v1 }
 0x2d4   :  { %v482_v59 = vsel %vm478_vm5, %v473_v15, %v378_v63  ;;  %v284_v9 = vpop.permute.xlu0 %283  ;;  %v290_v63 = vpop.permute.xlu1 %289 }
 0x2d5   :  { %v491_v6 = vsel %vm487_vm6, %v482_v59, %v402_v40  ;;  %v458_v40 = vsel %vm452_vm3, %v449_v37, %v310_v10  ;;  %v448_v61 = vsel %vm443_vm2, %v2123_v45, %v284_v9 }
 0x2d6   :  { %v500_v1 = vsel %vm496_vm7, %v491_v6, %v426_v3  ;;  %v467_v0 = vsel %vm461_vm4, %v458_v40, %v334_v13  ;;  %v2315_v13 = vld [vmem:[%s2787_s4 + $0x20] sm:$0xff] }
 0x2d7   :  { %v508_v27 = vmul.f32 %v500_v1, %v2286_v38  ;;  %v475_v7 = vsel %vm141_vm0, %v467_v0, %v358_v20  ;;  %v451_v0 = vsel %vm443_vm2, %v2167_v16, %v290_v63  ;;  %v2337_v63 = vld [vmem:[%s2787_s4 + $0x38] sm:$0xff] }
 0x2d8   :  { %v308_v39 = vpop.permute.xlu0 %307  ;;  %v314_v3 = vpop.permute.xlu1 %313  ;;  %v484_v18 = vsel %vm478_vm5, %v475_v7, %v382_v62 }
 0x2d9   :  { %v515_v44 = vpack.c.bf16 %v508_v27, %v507_v33  ;;  %v457_v8 = vsel %vm452_vm3, %v448_v61, %v308_v39  ;;  %v493_v6 = vsel %vm487_vm6, %v484_v18, %v406_v24  ;;  %v460_v61 = vsel %vm452_vm3, %v451_v0, %v314_v3 }
 0x2da   :  { %v502_v45 = vsel %vm496_vm7, %v493_v6, %v430_v29 }
 0x2db   :  { %1437 = vmatpush3.bf16.msra.mxu1 %v515_v44  ;;  %v510_v1 = vmul.f32 %v502_v45, %v2308_v14 }
 0x2dc   :  { %v332_v36 = vpop.permute.xlu0 %331  ;;  %1438 = vmatprep.subr.bf16.mxu1 %v2815_v2  ;;  %v338_v20 = vpop.permute.xlu1 %337 }
 0x2dd   :  { %v466_v59 = vsel %vm461_vm4, %v457_v8, %v332_v36  ;;  %v469_v7 = vsel %vm461_vm4, %v460_v61, %v338_v20  ;;  %v2344_v20 = vld [vmem:[%s2787_s4 + $0x30] sm:$0xff] }
 0x2e0   :  { %v356_v28 = vpop.permute.xlu0 %355  ;;  %v362_v44 = vpop.permute.xlu1 %361 }
 0x2e1   :  { %v474_v46 = vsel %vm141_vm0, %v466_v59, %v356_v28 }
 0x2e4   :  { %v380_v34 = vpop.permute.xlu0 %379  ;;  %v386_v36 = vpop.permute.xlu1 %385 }
 0x2e5   :  { %v483_v10 = vsel %vm478_vm5, %v474_v46, %v380_v34 }
 0x2e8   :  { %v404_v15 = vpop.permute.xlu0 %403  ;;  %v410_v37 = vpop.permute.xlu1 %409 }
 0x2e9   :  { %v492_v62 = vsel %vm487_vm6, %v483_v10, %v404_v15  ;;  %v477_v15 = vsel %vm141_vm0, %v469_v7, %v362_v44 }
 0x2ea   :  { %v486_v46 = vsel %vm478_vm5, %v477_v15, %v386_v36  ;;  %v2817_v36 = vpack.c.bf16 %v1970_v51, %v1935_v41  ;;  %v2821_v41 = vpack.c.bf16 %v1984_v55, %v1964_v49 }
 0x2eb   :  { %v495_v10 = vsel %vm487_vm6, %v486_v46, %v410_v37 }
 0x2ec   :  { %v428_v24 = vpop.permute.xlu0 %427  ;;  %v434_v18 = vpop.permute.xlu1 %433 }
 0x2ed   :  { %v501_v9 = vsel %vm496_vm7, %v492_v62, %v428_v24 }
 0x2ee   :  { %v509_v33 = vmul.f32 %v501_v9, %v2315_v13 }
 0x2f0   :  { %v288_v27 = vpop.permute.xlu0 %287  ;;  %v516_v39 = vpack.c.bf16 %v510_v1, %v509_v33  ;;  %v757_v44 = vpop.permute.xlu1 %756 }
 0x2f1   :  { %v450_v8 = vsel %vm443_vm2, %v2157_v60, %v288_v27  ;;  %v504_v60 = vsel %vm496_vm7, %v495_v10, %v434_v18 }
 0x2f2   :  { %1439 = vmatpush3.bf16.msra.mxu1 %v516_v39  ;;  %v512_v1 = vmul.f32 %v504_v60, %v2337_v63 }
 0x2f3   :  { %1440 = vmatprep.subr.bf16.mxu1 %v2815_v2 }
 0x2f4   :  { %v312_v29 = vpop.permute.xlu0 %311 }
 0x2f5   :  { %v459_v59 = vsel %vm452_vm3, %v450_v8, %v312_v29  ;;  %v2816_v29 = vpack.c.bf16 %v1914_v35, %v1880_v25  ;;  %v2819_v25 = vpack.c.bf16 %v1976_v53, %v1941_v43  ;;  %v2820_v35 = vpack.c.bf16 %v1979_v54, %v1961_v48 }
 0x2f6   :  { %v2823_v43 = vpack.c.bf16 %v1993_v58, %v1990_v57  ;;  %v2824_v48 = vpack.c.bf16 %v2017_v5, %v2015_v4 }
 0x2f8   :  { %v336_v28 = vpop.permute.xlu0 %335 }
 0x2f9   :  { %v468_v45 = vsel %vm461_vm4, %v459_v59, %v336_v28  ;;  %v2818_v28 = vpack.c.bf16 %v1973_v52, %v1938_v42  ;;  %v2822_v42 = vpack.c.bf16 %v1987_v56, %v1967_v50 }
 0x2fc   :  { %v360_v34 = vpop.permute.xlu0 %359 }
 0x2fd   :  { %v476_v16 = vsel %vm141_vm0, %v468_v45, %v360_v34  ;;  %v2487_v34 = vld [vmem:[#allocation5 + $0x8] sm:$0xff] }
 0x300   :  { %v384_v40 = vpop.permute.xlu0 %383 }
 0x301   :  { %v485_v3 = vsel %vm478_vm5, %v476_v16, %v384_v40  ;;  %v2524_v16 = vld [vmem:[%s2789_s6] sm:$0xff]  }
 0x302   :  { %1447 = vmatpush3.bf16.msra.mxu0 %v2524_v16 }
 0x303   :  { %1448 = vmatprep.subr.bf16.mxu0 %v2815_v2 }
 0x304   :  { %v408_v6 = vpop.permute.xlu0 %407 }
 0x305   :  { %v494_v62 = vsel %vm487_vm6, %v485_v3, %v408_v6  ;;  %v2533_v3 = vld [vmem:[%s2789_s6 + $0x8] sm:$0xff]  }
 0x306   :  { %1449 = vmatpush3.bf16.msra.mxu0 %v2533_v3 }
 0x307   :  { %1450 = vmatprep.subr.bf16.mxu0 %v2815_v2 }
 0x308   :  { %v432_v24 = vpop.permute.xlu0 %431 }
 0x309   :  { %v503_v9 = vsel %vm496_vm7, %v494_v62, %v432_v24 }
 0x30a   :  { %v511_v33 = vmul.f32 %v503_v9, %v2344_v20 }
 0x30c   :  { %v755_v27 = vpop.permute.xlu0 %754  ;;  %v517_v39 = vpack.c.bf16 %v512_v1, %v511_v33  ;;  %v2543_v1 = vld [vmem:[%s2789_s6 + $0x10] sm:$0xff]  }
 0x30d   :  { %760 = vxpose.xlu0.b32.start [1/2] (short) (narrow) %v755_v27, 64  ;;  %1451 = vmatpush3.bf16.msra.mxu0 %v2543_v1 }
 0x30e   :  { %1441 = vmatpush3.bf16.msra.mxu1 %v517_v39  ;;  %1452 = vmatprep.subr.bf16.mxu0 %v2815_v2 }
 0x30f   :  { %1466 = vmatprep.subr.bf16.mxu1 %v2815_v2 }
 0x311   :  { %761 = vxpose.xlu0.b32.end [2/2] (short) (narrow) %v757_v44, 64  ;;  %1443 = vmatmul.mubr.msk.bf16.vlgmr.msra.gmra.mrb[0].mxu1 %vm141_vm0, %v2816_v29  ;;  %v2551_v44 = vld [vmem:[%s2789_s6 + $0x18] sm:$0xff]  }
 0x312   :  { %1467 = vmatpush3.bf16.msra.mxu1 %v2817_v36  ;;  %1482 = vmatprep.mubr.msk.bf16.mxu1 %vm1733_vm1, %v2815_v2 }
 0x313   :  { %1468 = vmatprep.subr.bf16.mxu1 %v2815_v2  ;;  %1453 = vmatpush3.bf16.msra.mxu0 %v2551_v44 }
 0x314   :  { %1454 = vmatprep.subr.bf16.mxu0 %v2815_v2 }
 0x316   :  { %1469 = vmatpush3.bf16.msra.mxu1 %v2818_v28 }
 0x317   :  { %1470 = vmatprep.subr.bf16.mxu1 %v2815_v2 }
 0x31a   :  { %1471 = vmatpush3.bf16.msra.mxu1 %v2819_v25 }
 0x31b   :  { %1472 = vmatprep.subr.bf16.mxu1 %v2815_v2 }
 0x31e   :  { %1473 = vmatpush3.bf16.msra.mxu1 %v2820_v35 }
 0x31f   :  { %1474 = vmatprep.subr.bf16.mxu1 %v2815_v2 }
 0x322   :  { %1475 = vmatpush3.bf16.msra.mxu1 %v2821_v41 }
 0x323   :  { %1476 = vmatprep.subr.bf16.mxu1 %v2815_v2 }
 0x326   :  { %1477 = vmatpush3.bf16.msra.mxu1 %v2822_v42 }
 0x327   :  { %1478 = vmatprep.subr.bf16.mxu1 %v2815_v2 }
 0x32a   :  { %1479 = vmatpush3.bf16.msra.mxu1 %v2823_v43 }
 0x32b   :  { %1480 = vmatprep.subr.bf16.mxu1 %v2815_v2 }
 0x32e   :  { %1481 = vmatpush3.bf16.msra.mxu1 %v2824_v48 }
 0x32f   :  { %1498 = vmatprep.subr.bf16.mxu1 %v2815_v2 }
 0x38d   :  { %v2389_v49 = vpop.trf.xlu0 }
 0x38e   :  { %800 = vrot.lane.b32.xlu1 %v2389_v49, %s1726_s5 }
 0x391   :  { %v2393_v50 = vpop.trf.xlu0 }
 0x392   :  { %802 = vrot.lane.b32.xlu1 %v2393_v50, %s1726_s5 }
 0x395   :  { %v2397_v51 = vpop.trf.xlu0 }
 0x396   :  { %824 = vrot.lane.b32.xlu1 %v2389_v49, %s1727_s13 }
 0x399   :  { %v2401_v52 = vpop.trf.xlu0 }
 0x39a   :  { %826 = vrot.lane.b32.xlu1 %v2393_v50, %s1727_s13  ;;  %830 = vrot.lane.b32.xlu0 %v2401_v52, %s1727_s13 }
 0x39d   :  { %v2411_v53 = vpop.trf.xlu0 }
 0x39e   :  { %848 = vrot.lane.b32.xlu1 %v2389_v49, %s1728_s3  ;;  %876 = vrot.lane.b32.xlu0 %v2397_v51, %s1723_s0 }
 0x3a1   :  { %v2445_v54 = vpop.trf.xlu0 }
 0x3a2   :  { %850 = vrot.lane.b32.xlu1 %v2393_v50, %s1728_s3  ;;  %808 = vrot.lane.b32.xlu0 %v2411_v53, %s1726_s5 }
 0x3a5   :  { %v2455_v55 = vpop.trf.xlu0 }
 0x3a6   :  { %872 = vrot.lane.b32.xlu1 %v2389_v49, %s1723_s0  ;;  %900 = vrot.lane.b32.xlu0 %v2397_v51, %s1731_s14 }
 0x3a9   :  { %v2503_v0 = vpop.trf.xlu0 }
 0x3aa   :  { %874 = vrot.lane.b32.xlu1 %v2393_v50, %s1723_s0  ;;  %832 = vrot.lane.b32.xlu0 %v2411_v53, %s1727_s13 }
 0x3ae   :  { %804 = vrot.lane.b32.xlu1 %v2397_v51, %s1726_s5  ;;  %924 = vrot.lane.b32.xlu0 %v2397_v51, %s1729_s7 }
 0x3b2   :  { %806 = vrot.lane.b32.xlu1 %v2401_v52, %s1726_s5  ;;  %856 = vrot.lane.b32.xlu0 %v2411_v53, %s1728_s3 }
 0x3b6   :  { %896 = vrot.lane.b32.xlu1 %v2389_v49, %s1731_s14  ;;  %948 = vrot.lane.b32.xlu0 %v2397_v51, %s1730_s10 }
 0x3ba   :  { %898 = vrot.lane.b32.xlu1 %v2393_v50, %s1731_s14  ;;  %880 = vrot.lane.b32.xlu0 %v2411_v53, %s1723_s0 }
 0x3be   :  { %828 = vrot.lane.b32.xlu1 %v2397_v51, %s1727_s13  ;;  %904 = vrot.lane.b32.xlu0 %v2411_v53, %s1731_s14 }
 0x3c2   :  { %920 = vrot.lane.b32.xlu1 %v2389_v49, %s1729_s7  ;;  %928 = vrot.lane.b32.xlu0 %v2411_v53, %s1729_s7 }
 0x3c6   :  { %922 = vrot.lane.b32.xlu1 %v2393_v50, %s1729_s7  ;;  %952 = vrot.lane.b32.xlu0 %v2411_v53, %s1730_s10 }
 0x3ca   :  { %852 = vrot.lane.b32.xlu1 %v2397_v51, %s1728_s3  ;;  %812 = vrot.lane.b32.xlu0 %v2455_v55, %s1726_s5 }
 0x3ce   :  { %854 = vrot.lane.b32.xlu1 %v2401_v52, %s1728_s3  ;;  %836 = vrot.lane.b32.xlu0 %v2455_v55, %s1727_s13 }
 0x3d2   :  { %944 = vrot.lane.b32.xlu1 %v2389_v49, %s1730_s10  ;;  %860 = vrot.lane.b32.xlu0 %v2455_v55, %s1728_s3 }
 0x3d6   :  { %946 = vrot.lane.b32.xlu1 %v2393_v50, %s1730_s10  ;;  %884 = vrot.lane.b32.xlu0 %v2455_v55, %s1723_s0 }
 0x3da   :  { %878 = vrot.lane.b32.xlu1 %v2401_v52, %s1723_s0 }
 0x3de   :  { %902 = vrot.lane.b32.xlu1 %v2401_v52, %s1731_s14 }
 0x3e2   :  { %926 = vrot.lane.b32.xlu1 %v2401_v52, %s1729_s7 }
 0x3e4   :  { %v2479_v56 = vpop.f32.mrb[0].mxu1 }
 0x3e5   :  { %v1444_v57 = vpop.f32.mrb[1].mxu1 }
 0x3e6   :  { %950 = vrot.lane.b32.xlu1 %v2401_v52, %s1730_s10  ;;  %v558_v58 = vpop.f32.mrb[2].mxu1 }
 0x3e7   :  { %v1445_v4 = vpop.f32.mrb[3].mxu1  ;;  %v563_v5 = vmul.f32 0.35355338, %v558_v58  ;;  %v562_v58 = vmul.f32 0.35355338, %v2479_v56 }
 0x3e9   :  { %v2492_v37 = vadd.f32 %v563_v5, %v2487_v34 }
 0x3ea   :  { %810 = vrot.lane.b32.xlu1 %v2445_v54, %s1726_s5 }
 0x3ee   :  { %834 = vrot.lane.b32.xlu1 %v2445_v54, %s1727_s13 }
 0x3f2   :  { %858 = vrot.lane.b32.xlu1 %v2445_v54, %s1728_s3 }
 0x3f5   :  { %568 = vmax.xlane.f32.xlu0 %v2492_v37 }
 0x3f6   :  { %882 = vrot.lane.b32.xlu1 %v2445_v54, %s1723_s0 }
 0x3fa   :  { %906 = vrot.lane.b32.xlu1 %v2445_v54, %s1731_s14 }
 0x3fe   :  { %930 = vrot.lane.b32.xlu1 %v2445_v54, %s1729_s7 }
 0x400   :  { %v801_v40 = vpop.permute.xlu1 %800 }
 0x401   :  { %v968_v7 = vsel %vm443_vm2, %v2389_v49, %v801_v40  ;;  %v2570_v40 = vld [vmem:[#allocation5] sm:$0xff] }
 0x402   :  { %954 = vrot.lane.b32.xlu1 %v2445_v54, %s1730_s10 }
 0x404   :  { %v803_v61 = vpop.permute.xlu1 %802 }
 0x405   :  { %v969_v18 = vsel %vm443_vm2, %v2393_v50, %v803_v61 }
 0x406   :  { %814 = vrot.lane.b32.xlu1 %v2503_v0, %s1726_s5 }
 0x408   :  { %v825_v8 = vpop.permute.xlu1 %824 }
 0x409   :  { %v976_v15 = vsel %vm452_vm3, %v968_v7, %v825_v8 }
 0x40a   :  { %838 = vrot.lane.b32.xlu1 %v2503_v0, %s1727_s13 }
 0x40b   :  { %908 = vrot.lane.b32.xlu0 %v2455_v55, %s1731_s14 }
 0x40c   :  { %v827_v59 = vpop.permute.xlu1 %826  ;;  %v831_v6 = vpop.permute.xlu0 %830 }
 0x40d   :  { %v977_v46 = vsel %vm452_vm3, %v969_v18, %v827_v59 }
 0x40e   :  { %862 = vrot.lane.b32.xlu1 %v2503_v0, %s1728_s3 }
 0x40f   :  { %932 = vrot.lane.b32.xlu0 %v2455_v55, %s1729_s7 }
 0x410   :  { %v849_v45 = vpop.permute.xlu1 %848  ;;  %v877_v10 = vpop.permute.xlu0 %876 }
 0x411   :  { %v984_v60 = vsel %vm461_vm4, %v976_v15, %v849_v45 }
 0x412   :  { %886 = vrot.lane.b32.xlu1 %v2503_v0, %s1723_s0 }
 0x413   :  { %956 = vrot.lane.b32.xlu0 %v2455_v55, %s1730_s10 }
 0x414   :  { %v851_v62 = vpop.permute.xlu1 %850  ;;  %v809_v24 = vpop.permute.xlu0 %808 }
 0x415   :  { %v985_v9 = vsel %vm461_vm4, %v977_v46, %v851_v62  ;;  %v972_v29 = vsel %vm443_vm2, %v2411_v53, %v809_v24 }
 0x418   :  { %v873_v33 = vpop.permute.xlu1 %872  ;;  %v901_v27 = vpop.permute.xlu0 %900 }
 0x419   :  { %v992_v39 = vsel %vm141_vm0, %v984_v60, %v873_v33 }
 0x41c   :  { %v875_v36 = vpop.permute.xlu1 %874  ;;  %v833_v28 = vpop.permute.xlu0 %832 }
 0x41d   :  { %v993_v25 = vsel %vm141_vm0, %v985_v9, %v875_v36  ;;  %v2558_v35 = vsel %vm452_vm3, %v972_v29, %v833_v28  ;;  %v2589_v9 = vld [vmem:[%s2789_s6 + $0x20] sm:$0xff]   ;;  %v2602_v29 = vld [vmem:[%s2789_s6 + $0x28] sm:$0xff]  }
 0x41e   :  { %1455 = vmatpush3.bf16.msra.mxu0 %v2589_v9 }
 0x41f   :  { %1456 = vmatprep.subr.bf16.mxu0 %v2815_v2 }
 0x420   :  { %v805_v41 = vpop.permute.xlu1 %804 }
 0x421   :  { %v970_v4 = vsel %vm443_vm2, %v2397_v51, %v805_v41 }
 0x422   :  { %1457 = vmatpush3.bf16.msra.mxu0 %v2602_v29 }
 0x423   :  { %1458 = vmatprep.subr.bf16.mxu0 %v2815_v2 }
 0x424   :  { %v807_v42 = vpop.permute.xlu1 %806 }
 0x425   :  { %v971_v43 = vsel %vm443_vm2, %v2401_v52, %v807_v42  ;;  %v2574_v52 = vadd.f32 %v562_v58, %v2570_v40 }
 0x426   :  { %v979_v48 = vsel %vm452_vm3, %v971_v43, %v831_v6  ;;  %v2625_v43 = vld [vmem:[%s2789_s6 + $0x38] sm:$0xff]  }
 0x427   :  { %2826 = vst [vmem:[#allocation22_spill] sm:$0xff] %v2625_v43 }
 0x428   :  { %v897_v49 = vpop.permute.xlu1 %896 }
 0x429   :  { %v1000_v50 = vsel %vm478_vm5, %v992_v39, %v897_v49 }
 0x42c   :  { %v899_v53 = vpop.permute.xlu1 %898 }
 0x42d   :  { %v1001_v57 = vsel %vm478_vm5, %v993_v25, %v899_v53 }
 0x430   :  { %v829_v5 = vpop.permute.xlu1 %828 }
 0x431   :  { %v978_v61 = vsel %vm452_vm3, %v970_v4, %v829_v5 }
 0x434   :  { %v921_v7 = vpop.permute.xlu1 %920 }
 0x435   :  { %v1008_v8 = vsel %vm487_vm6, %v1000_v50, %v921_v7 }
 0x436   :  { %566 = vmax.xlane.f32.xlu1 %v2574_v52 }
 0x438   :  { %v923_v15 = vpop.permute.xlu1 %922 }
 0x439   :  { %v1009_v18 = vsel %vm487_vm6, %v1001_v57, %v923_v15 }
 0x43c   :  { %v853_v56 = vpop.permute.xlu1 %852 }
 0x43d   :  { %v986_v59 = vsel %vm461_vm4, %v978_v61, %v853_v56 }
 0x43e   :  { %v994_v51 = vsel %vm141_vm0, %v986_v59, %v877_v10  ;;  %v925_v10 = vpop.permute.xlu0 %924 }
 0x43f   :  { %v1002_v6 = vsel %vm478_vm5, %v994_v51, %v901_v27 }
 0x440   :  { %v855_v46 = vpop.permute.xlu1 %854 }
 0x441   :  { %v987_v45 = vsel %vm461_vm4, %v979_v48, %v855_v46  ;;  %v1010_v48 = vsel %vm487_vm6, %v1002_v6, %v925_v10 }
 0x442   :  { %v857_v25 = vpop.permute.xlu0 %856 }
 0x444   :  { %v945_v60 = vpop.permute.xlu1 %944 }
 0x445   :  { %v1016_v62 = vsel %vm496_vm7, %v1008_v8, %v945_v60 }
 0x446   :  { %v2593_v27 = vmul.f32 %v1016_v62, %v2250_v11  ;;  %v949_v53 = vpop.permute.xlu0 %948 }
 0x447   :  { %910 = vrot.lane.b32.xlu1 %v2503_v0, %s1731_s14  ;;  %v1018_v57 = vsel %vm496_vm7, %v1010_v48, %v949_v53 }
 0x448   :  { %v947_v24 = vpop.permute.xlu1 %946  ;;  %v2634_v5 = vmul.f32 %v1018_v57, %v2279_v12 }
 0x449   :  { %v1017_v33 = vsel %vm496_vm7, %v1009_v18, %v947_v24 }
 0x44a   :  { %v2596_v39 = vmul.f32 %v1017_v33, %v2257_v47  ;;  %v2614_v47 = vld [vmem:[%s2789_s6 + $0x30] sm:$0xff]   ;;  %v881_v18 = vpop.permute.xlu0 %880 }
 0x44b   :  { %934 = vrot.lane.b32.xlu1 %v2503_v0, %s1729_s7  ;;  %2825 = vst [vmem:[#allocation21_spill] sm:$0xff] %v2614_v47  ;;  %1459 = vmatpush3.bf16.msra.mxu0 %v2614_v47 }
 0x44c   :  { %v879_v11 = vpop.permute.xlu1 %878  ;;  %1460 = vmatprep.subr.bf16.mxu0 %v2815_v2 }
 0x44d   :  { %v995_v28 = vsel %vm141_vm0, %v987_v45, %v879_v11 }
 0x44e   :  { %v905_v59 = vpop.permute.xlu0 %904 }
 0x44f   :  { %958 = vrot.lane.b32.xlu1 %v2503_v0, %s1730_s10  ;;  %1461 = vmatpush3.bf16.msra.mxu0 %v2625_v43 }
 0x450   :  { %v903_v41 = vpop.permute.xlu1 %902  ;;  %1486 = vmatprep.subr.bf16.mxu0 %v2815_v2 }
 0x451   :  { %v1003_v42 = vsel %vm478_vm5, %v995_v28, %v903_v41 }
 0x452   :  { %v929_v6 = vpop.permute.xlu0 %928 }
 0x454   :  { %v927_v49 = vpop.permute.xlu1 %926 }
 0x455   :  { %v1011_v50 = vsel %vm487_vm6, %v1003_v42, %v927_v49 }
 0x456   :  { %v953_v45 = vpop.permute.xlu0 %952 }
 0x458   :  { %v951_v58 = vpop.permute.xlu1 %950 }
 0x459   :  { %v1019_v4 = vsel %vm496_vm7, %v1011_v50, %v951_v58 }
 0x45a   :  { %v2637_v61 = vmul.f32 %v1019_v4, %v2286_v38  ;;  %v813_v62 = vpop.permute.xlu0 %812 }
 0x45c   :  { %v811_v8 = vpop.permute.xlu1 %810 }
 0x45d   :  { %v973_v7 = vsel %vm443_vm2, %v2445_v54, %v811_v8 }
 0x45e   :  { %v837_v12 = vpop.permute.xlu0 %836 }
 0x460   :  { %v835_v15 = vpop.permute.xlu1 %834 }
 0x461   :  { %v981_v36 = vsel %vm452_vm3, %v973_v7, %v835_v15 }
 0x462   :  { %v861_v10 = vpop.permute.xlu0 %860 }
 0x464   :  { %v859_v56 = vpop.permute.xlu1 %858 }
 0x466   :  { %v885_v11 = vpop.permute.xlu0 %884 }
 0x468   :  { %v883_v51 = vpop.permute.xlu1 %882 }
 0x46c   :  { %v907_v46 = vpop.permute.xlu1 %906 }
 0x470   :  { %v931_v60 = vpop.permute.xlu1 %930 }
 0x474   :  { %v955_v24 = vpop.permute.xlu1 %954 }
 0x478   :  { %v815_v33 = vpop.permute.xlu1 %814 }
 0x479   :  { %v975_v54 = vsel %vm443_vm2, %v2503_v0, %v815_v33 }
 0x47c   :  { %v839_v38 = vpop.permute.xlu1 %838 }
 0x47d   :  { %v983_v15 = vsel %vm452_vm3, %v975_v54, %v839_v38 }
 0x480   :  { %v863_v28 = vpop.permute.xlu1 %862 }
 0x482   :  { %v569_v41 = vpop.xlane.xlu0 %568 }
 0x483   :  { %v571_v42 = vsub.f32 %v2492_v37, %v569_v41  ;;  %v989_v37 = vsel %vm461_vm4, %v981_v36, %v859_v56 }
 0x484   :  { %v887_v48 = vpop.permute.xlu1 %886 }
 0x485   :  { %v574_v49 = vmul.f32 1.442695, %v571_v42  ;;  %v997_v42 = vsel %vm141_vm0, %v989_v37, %v883_v51  ;;  %v974_v51 = vsel %vm443_vm2, %v2455_v55, %v813_v62 }
 0x486   :  { %v909_v4 = vpop.permute.xlu0 %908 }
 0x487   :  { %1608 = vpow2.f32 %v574_v49  ;;  %v988_v49 = vsel %vm461_vm4, %v2558_v35, %v857_v25  ;;  %v991_v25 = vsel %vm461_vm4, %v983_v15, %v863_v28 }
 0x488   :  { %v996_v8 = vsel %vm141_vm0, %v988_v49, %v881_v18  ;;  %v999_v18 = vsel %vm141_vm0, %v991_v25, %v887_v48 }
 0x489   :  { %v1004_v56 = vsel %vm478_vm5, %v996_v8, %v905_v59 }
 0x48a   :  { %v1012_v0 = vsel %vm487_vm6, %v1004_v56, %v929_v6 }
 0x48b   :  { %v1020_v55 = vsel %vm496_vm7, %v1012_v0, %v953_v45 }
 0x48c   :  { %v1028_v28 = vmul.f32 %v1020_v55, %v2315_v13  ;;  %v1032_v13 = vpack.c.bf16 %v2199_v17, %v2229_v32  ;;  %v2831_v32 = vpack.c.bf16 %v2065_v31, %v2062_v30  ;;  %v2834_v17 = vld [vmem:[#allocation14_spill] sm:$0xff]  ;;  %v2841_v31 = vld [vmem:[#allocation17_spill] sm:$0xff] }
 0x48d   :  { %v2840_v30 = vld [vmem:[#allocation18_spill] sm:$0xff] }
 0x491   :  { %v2646_v47 = vpop.eup %1608 }
 0x4c3   :  { %v567_v50 = vpop.xlane.xlu1 %566 }
 0x4c4   :  { %v570_v53 = vsub.f32 %v2574_v52, %v567_v50  ;;  %v933_v52 = vpop.permute.xlu0 %932  ;;  %v1005_v50 = vsel %vm478_vm5, %v997_v42, %v907_v46  ;;  %v982_v46 = vsel %vm452_vm3, %v974_v51, %v837_v12 }
 0x4c5   :  { %v1013_v36 = vsel %vm487_vm6, %v1005_v50, %v931_v60  ;;  %v2827_v60 = vpack.c.bf16 %v2596_v39, %v2593_v27  ;;  %v990_v59 = vsel %vm461_vm4, %v982_v46, %v861_v10  ;;  %v2828_v10 = vpack.c.bf16 %v2637_v61, %v2634_v5 }
 0x4c6   :  { %v572_v57 = vmul.f32 1.442695, %v570_v53  ;;  %v1021_v35 = vsel %vm496_vm7, %v1013_v36, %v955_v24  ;;  %v998_v6 = vsel %vm141_vm0, %v990_v59, %v885_v11  ;;  %v2829_v5 = vpack.c.bf16 %v2053_v22, %v2050_v19  ;;  %v2832_v19 = vld [vmem:[#allocation12_spill] sm:$0xff] }
 0x4c7   :  { %v911_v58 = vpop.permute.xlu1 %910  ;;  %v1029_v24 = vmul.f32 %v1021_v35, %v2308_v14  ;;  %v1006_v27 = vsel %vm478_vm5, %v998_v6, %v909_v4  ;;  %v2833_v22 = vpack.c.bf16 %v2071_v23, %v2832_v19  ;;  %v2843_v23 = vld [vmem:[#allocation20_spill] sm:$0xff]  ;;  %v2844_v4 = vld [vmem:[#allocation19_spill] sm:$0xff] }
 0x4c8   :  { %1610 = vpow2.f32 %v572_v57  ;;  %v1007_v62 = vsel %vm478_vm5, %v999_v18, %v911_v58  ;;  %v957_v12 = vpop.permute.xlu0 %956  ;;  %v1014_v45 = vsel %vm487_vm6, %v1006_v27, %v933_v52  ;;  %v2842_v58 = vpack.c.bf16 %v2840_v30, %v2841_v31 }
 0x4c9   :  { %v1022_v48 = vsel %vm496_vm7, %v1014_v45, %v957_v12  ;;  %v1035_v14 = vpack.c.bf16 %v1029_v24, %v1028_v28  ;;  %v2845_v37 = vpack.c.bf16 %v2843_v23, %v2844_v4 }
 0x4cb   :  { %v935_v43 = vpop.permute.xlu1 %934 }
 0x4cc   :  { %v1015_v38 = vsel %vm487_vm6, %v1007_v62, %v935_v43  ;;  %v1030_v43 = vmul.f32 %v1022_v48, %v2344_v20  ;;  %v2835_v20 = vld [vmem:[#allocation13_spill] sm:$0xff] }
 0x4cd   :  { %v2836_v61 = vpack.c.bf16 %v2834_v17, %v2835_v20 }
 0x4cf   :  { %v959_v33 = vpop.permute.xlu1 %958 }
 0x4d0   :  { %v1023_v39 = vsel %vm496_vm7, %v1015_v38, %v959_v33 }
 0x4d1   :  { %v1031_v11 = vmul.f32 %v1023_v39, %v2337_v63  ;;  %v2830_v63 = vpack.c.bf16 %v2059_v21, %v2056_v26  ;;  %v2837_v26 = vld [vmem:[#allocation16_spill] sm:$0xff]  ;;  %v2838_v21 = vld [vmem:[#allocation15_spill] sm:$0xff] }
 0x4d2   :  { %v2649_v41 = vpop.eup %1610  ;;  %v2839_v57 = vpack.c.bf16 %v2837_v26, %v2838_v21 }
 0x4d3   :  { %v576_v7 = vpack.c.bf16 %v2646_v47, %v2649_v41  ;;  %v1036_v53 = vpack.c.bf16 %v1031_v11, %v1030_v43  ;;  %v1601_v11 = vld [vmem:[#allocation7 + $0x8] sm:$0xff]   ;;  %v1602_v43 = vld [vmem:[#allocation7 + $0x10] sm:$0xff]  }
 0x4d5   :  { %1463 = vmatmul.mubr.bf16.vlgmr.msra.gmra.mrb[8].mxu0 %v576_v7 }
 0x4d6   :  { %1487 = vmatpush3.bf16.msra.mxu0 %v2827_v60  ;;  %1494 = vmatprep.mubr.msk.bf16.mxu0 %vm1733_vm1, %v2815_v2 }
 0x4d7   :  { %1488 = vmatprep.subr.bf16.mxu0 %v2815_v2 }
 0x4da   :  { %1489 = vmatpush3.bf16.msra.mxu0 %v2828_v10 }
 0x4db   :  { %1490 = vmatprep.subr.bf16.mxu0 %v2815_v2 }
 0x4de   :  { %1491 = vmatpush3.bf16.msra.mxu0 %v1035_v14  ;;  %v1600_v14 = vld [vmem:[#allocation7] sm:$0xff]  }
 0x4df   :  { %1492 = vmatprep.subr.bf16.mxu0 %v2815_v2 }
 0x4e2   :  { %1493 = vmatpush3.bf16.msra.mxu0 %v1036_v53  ;;  %v1603_v53 = vld [vmem:[#allocation7 + $0x18] sm:$0xff]  }
 0x4e3   :  { %1518 = vmatprep.subr.bf16.mxu0 %v2815_v2 }
 0x4e5   :  { %1495 = vmatmul.mubr.msk.bf16.vlgmr.msra.gmra.mrb[12].mxu0 %vm141_vm0, %v1032_v13  ;;  %v1604_v13 = vld [vmem:[#allocation7 + $0x20] sm:$0xff]  }
 0x4e6   :  { %1519 = vmatpush3.bf16.msra.mxu0 %v2829_v5  ;;  %1534 = vmatprep.mubr.msk.bf16.mxu0 %vm1733_vm1, %v2815_v2  ;;  %v1605_v5 = vld [vmem:[#allocation7 + $0x28] sm:$0xff]  }
 0x4e7   :  { %1520 = vmatprep.subr.bf16.mxu0 %v2815_v2 }
 0x4ea   :  { %1521 = vmatpush3.bf16.msra.mxu0 %v2830_v63  ;;  %v1606_v63 = vld [vmem:[#allocation7 + $0x30] sm:$0xff]  }
 0x4eb   :  { %1522 = vmatprep.subr.bf16.mxu0 %v2815_v2 }
 0x4ee   :  { %1523 = vmatpush3.bf16.msra.mxu0 %v2831_v32  ;;  %v1607_v32 = vld [vmem:[#allocation7 + $0x38] sm:$0xff]  }
 0x4ef   :  { %1524 = vmatprep.subr.bf16.mxu0 %v2815_v2 }
 0x4f2   :  { %1525 = vmatpush3.bf16.msra.mxu0 %v2833_v22 }
 0x4f3   :  { %1526 = vmatprep.subr.bf16.mxu0 %v2815_v2 }
 0x4f6   :  { %1527 = vmatpush3.bf16.msra.mxu0 %v2836_v61 }
 0x4f7   :  { %1528 = vmatprep.subr.bf16.mxu0 %v2815_v2 }
 0x4fa   :  { %1529 = vmatpush3.bf16.msra.mxu0 %v2839_v57 }
 0x4fb   :  { %1530 = vmatprep.subr.bf16.mxu0 %v2815_v2 }
 0x4fe   :  { %1531 = vmatpush3.bf16.msra.mxu0 %v2842_v58 }
 0x4ff   :  { %1532 = vmatprep.subr.bf16.mxu0 %v2815_v2 }
 0x502   :  { %1533 = vmatpush3.bf16.msra.mxu0 %v2845_v37 }
 0x5a8   :  { %v675_v42 = vpop.f32.mrb[8].mxu0 }
 0x5a9   :  { %1612 = vrcp.f32 %v675_v42  ;;  %v1464_v52 = vpop.f32.mrb[9].mxu0 }
 0x5aa   :  { %v678_v49 = vpop.f32.mrb[10].mxu0 }
 0x5ab   :  { %1614 = vrcp.f32 %v678_v49  ;;  %v1465_v50 = vpop.f32.mrb[11].mxu0 }
 0x5b3   :  { %v1613_v54 = vpop.eup %1612 }
 0x5b4   :  { %v683_v8 = vmul.f32 %v1613_v54, %v2649_v41 }
 0x5b5   :  { %v1615_v7 = vpop.eup %1614 }
 0x5b6   :  { %v685_v36 = vmul.f32 %v1615_v7, %v2646_v47 }
 0x5b8   :  { %v1074_v15 = vpop.f32.mrb[12].mxu0  ;;  %v702_v56 = vpack.c.bf16 %v685_v36, %v683_v8 }
 0x5b9   :  { %v1081_v51 = vmul.f32 0.35355338, %v1074_v15  ;;  %v1496_v35 = vpop.f32.mrb[13].mxu0 }
 0x5ba   :  { %v1077_v25 = vpop.f32.mrb[14].mxu0  ;;  %1483 = vmatmul.mubr.bf16.vlgmr.msra.gmra.mrb[4].mxu1 %v702_v56 }
 0x5bb   :  { %v1083_v0 = vadd.f32 %v1081_v51, %v2570_v40  ;;  %v1082_v46 = vmul.f32 0.35355338, %v1077_v25  ;;  %v1497_v18 = vpop.f32.mrb[15].mxu0  ;;  %1499 = vmatpush3.bf16.msra.mxu1 %v2524_v16  ;;  %1514 = vmatprep.mubr.msk.bf16.mxu1 %vm1733_vm1, %v2815_v2  ;;  %v2847_v16 = vld [vmem:[#allocation22_spill] sm:$0xff] }
 0x5bc   :  { %1500 = vmatprep.subr.bf16.mxu1 %v2815_v2 }
 0x5bd   :  { %v1084_v41 = vadd.f32 %v1082_v46, %v2487_v34  ;;  %1085 = vmax.xlane.f32.xlu0 %v1083_v0  ;;  %v2846_v34 = vld [vmem:[#allocation21_spill] sm:$0xff] }
 0x5bf   :  { %1087 = vmax.xlane.f32.xlu1 %v1084_v41  ;;  %1501 = vmatpush3.bf16.msra.mxu1 %v2533_v3 }
 0x5c0   :  { %1502 = vmatprep.subr.bf16.mxu1 %v2815_v2 }
 0x5c3   :  { %1503 = vmatpush3.bf16.msra.mxu1 %v2543_v1 }
 0x5c4   :  { %1504 = vmatprep.subr.bf16.mxu1 %v2815_v2 }
 0x5c7   :  { %1505 = vmatpush3.bf16.msra.mxu1 %v2551_v44 }
 0x5c8   :  { %1506 = vmatprep.subr.bf16.mxu1 %v2815_v2 }
 0x5cb   :  { %1507 = vmatpush3.bf16.msra.mxu1 %v2589_v9 }
 0x5cc   :  { %1508 = vmatprep.subr.bf16.mxu1 %v2815_v2 }
 0x5cf   :  { %1509 = vmatpush3.bf16.msra.mxu1 %v2602_v29 }
 0x5d0   :  { %1510 = vmatprep.subr.bf16.mxu1 %v2815_v2 }
 0x5d3   :  { %1511 = vmatpush3.bf16.msra.mxu1 %v2846_v34 }
 0x5d4   :  { %1512 = vmatprep.subr.bf16.mxu1 %v2815_v2 }
 0x5d7   :  { %1513 = vmatpush3.bf16.msra.mxu1 %v2847_v16 }
 0x5d8   :  { %1538 = vmatprep.subr.bf16.mxu1 %v2815_v2 }
 0x64a   :  { %v1086_v3 = vpop.xlane.xlu0 %1085 }
 0x64b   :  { %v1089_v1 = vsub.f32 %v1083_v0, %v1086_v3 }
 0x64c   :  { %v1088_v44 = vpop.xlane.xlu1 %1087 }
 0x64d   :  { %v1091_v40 = vmul.f32 1.442695, %v1089_v1  ;;  %v1090_v47 = vsub.f32 %v1084_v41, %v1088_v44 }
 0x64f   :  { %v1093_v9 = vmul.f32 1.442695, %v1090_v47  ;;  %1616 = vpow2.f32 %v1091_v40 }
 0x651   :  { %1618 = vpow2.f32 %v1093_v9 }
 0x659   :  { %v1617_v33 = vpop.eup %1616 }
 0x65b   :  { %v1619_v29 = vpop.eup %1618 }
 0x65c   :  { %v1095_v60 = vpack.c.bf16 %v1619_v29, %v1617_v33 }
 0x65e   :  { %1515 = vmatmul.mubr.bf16.vlgmr.msra.gmra.mrb[8].mxu1 %v1095_v60 }
 0x65f   :  { %1554 = vmatprep.mubr.msk.bf16.mxu1 %vm1733_vm1, %v2815_v2  ;;  %1539 = vmatpush3.bf16.msra.mxu1 %v1600_v14 }
 0x660   :  { %1540 = vmatprep.subr.bf16.mxu1 %v2815_v2 }
 0x663   :  { %1541 = vmatpush3.bf16.msra.mxu1 %v1601_v11 }
 0x664   :  { %1542 = vmatprep.subr.bf16.mxu1 %v2815_v2 }
 0x667   :  { %1543 = vmatpush3.bf16.msra.mxu1 %v1602_v43 }
 0x668   :  { %1544 = vmatprep.subr.bf16.mxu1 %v2815_v2 }
 0x66b   :  { %1545 = vmatpush3.bf16.msra.mxu1 %v1603_v53 }
 0x66c   :  { %1546 = vmatprep.subr.bf16.mxu1 %v2815_v2 }
 0x66f   :  { %1547 = vmatpush3.bf16.msra.mxu1 %v1604_v13 }
 0x670   :  { %1548 = vmatprep.subr.bf16.mxu1 %v2815_v2 }
 0x673   :  { %1549 = vmatpush3.bf16.msra.mxu1 %v1605_v5 }
 0x674   :  { %1550 = vmatprep.subr.bf16.mxu1 %v2815_v2 }
 0x677   :  { %1551 = vmatpush3.bf16.msra.mxu1 %v1606_v63 }
 0x678   :  { %1552 = vmatprep.subr.bf16.mxu1 %v2815_v2  ;;  %v1370_v2 = vld [vmem:[%s2791_s8] ss:$0 sm:$0xff] }
 0x67b   :  { %1553 = vmatpush3.bf16.msra.mxu1 %v1607_v32 }
 0x68d   :  { %v745_v55 = vpop.f32.mrb[4].mxu1 }
 0x68e   :  { %v1484_v59 = vpop.f32.mrb[5].mxu1 }
 0x68f   :  { %v748_v62 = vpop.f32.mrb[6].mxu1 }
 0x690   :  { %v1485_v6 = vpop.f32.mrb[7].mxu1 }
 0x731   :  { %v1130_v24 = vpop.f32.mrb[8].mxu1 }
 0x732   :  { %1620 = vrcp.f32 %v1130_v24  ;;  %v1516_v12 = vpop.f32.mrb[9].mxu1 }
 0x733   :  { %v1133_v38 = vpop.f32.mrb[10].mxu1 }
 0x734   :  { %1622 = vrcp.f32 %v1133_v38  ;;  %v1517_v27 = vpop.f32.mrb[11].mxu1 }
 0x73c   :  { %v1621_v39 = vpop.eup %1620 }
 0x73d   :  { %v1138_v45 = vmul.f32 %v1621_v39, %v1617_v33 }
 0x73e   :  { %v1623_v28 = vpop.eup %1622 }
 0x73f   :  { %v1140_v10 = vmul.f32 %v1623_v28, %v1619_v29 }
 0x741   :  { %v1157_v48 = vpack.c.bf16 %v1140_v10, %v1138_v45 }
 0x743   :  { %1535 = vmatmul.mubr.bf16.vlgmr.msra.gmra.mrb[16].mxu0 %v1157_v48 }
 0x816   :  { %v1200_v19 = vpop.f32.mrb[16].mxu0 }
 0x817   :  { %v1536_v22 = vpop.f32.mrb[17].mxu0 }
 0x818   :  { %v1203_v17 = vpop.f32.mrb[18].mxu0 }
 0x819   :  { %v1575_v20 = vpack.i.bf16 %v1203_v17, %v1200_v19  ;;  %v1537_v61 = vpop.f32.mrb[19].mxu0 }
 0x81b   :  { %1576 = vrot.lane.b32.xlu0 %v1575_v20, %s1723_s0  ;;  %s1690_s0 = scalar_lea.vmem %s1338_s1, 256 }
 0x81c   :  { %p1691_p10 = scmp.ne.s32.totalorder %s1338_s1, %s1690_s0  ;;  %p1696_p12 = scmp.lt.s32.totalorder %s1690_s0, %s1690_s0 }
 0x81e   :  { %p1697_p13 = por %p1696_p12, %p1695_p11 }
 0x820   :  { %p1698_p0 = pnand %p1697_p13, %p1691_p10 }
 0x88d   :  { %v1577_v26 = vpop.permute.xlu0 %1576 }
 0x88e   :  { %v1579_v21 = vunpack.i.h.bf16 %v1577_v26  ;;  %v1578_v57 = vunpack.i.l.bf16 %v1577_v26 }
 0x890   :  { %v1216_v30 = vsel %vm141_vm0, %v748_v62, %v1579_v21  ;;  %v1215_v31 = vsel %vm141_vm0, %v745_v55, %v1578_v57 }
 0x891   :  { %v1217_v58 = vpack.c.bf16 %v1216_v30, %v1215_v31 }
 0x893   :  { %1555 = vmatmul.mubr.bf16.vlgmr.msra.gmra.mrb[12].mxu1 %v1217_v58 }
 0x966   :  { %v1323_v23 = vpop.f32.mrb[12].mxu1 }
 0x967   :  { %v1324_v4 = vadd.f32 %v1370_v2, %v1323_v23  ;;  %v1556_v37 = vpop.f32.mrb[13].mxu1 }
 0x968   :  { %v1326_v42 = vpop.f32.mrb[14].mxu1 }
 0x969   :  { %1330 = vst [vmem:[#allocation8] sm:$0xff] %v1324_v4  ;;  %v1327_v52 = vadd.f32 %v1370_v2, %v1326_v42  ;;  %v1557_v49 = vpop.f32.mrb[15].mxu1 }
 0x96b   :  { %1331 = vst [vmem:[#allocation8 + $0x8] sm:$0xff] %v1327_v52 }
 0x96c   :  { %1701 = shalt.err (!%p1698_p0)
}
 0x96d   :  { %s1702_s26 = scalar_lea.hbm %s2792_s9, 256 }
 0x96e   :  { %p1703_p1 = scmp.ne.s32.totalorder %s2792_s9, %s1702_s26  ;;  %p1706_p2 = scmp.lt.u32.totalorder %s1702_s26, %s2792_s9 }
 0x970   :  { %p1708_p3 = pnand %p1706_p2, %p1703_p1 }
 0x972   :  { %1711 = shalt.err (!%p1708_p3)
}
 0x973   :  { %1343 = dma.vmem_to_hbm [thread:$0]  %s1338_s1, 256, %s2792_s9, [#allocation4], %s1720_s21, %s1720_s21, %s1721_s22  }
 0x974   :  { %1716 = dma.done.wait [#allocation4], 256  }
 0x975   :  { %1717 = vsyncadd [#allocation4], 4294967040 }
 0x976   :  { %1347 = vsyncpa [#allocation3], 1 }
 0x977   :  { %1348 = vsyncpa [#allocation6], 1 }
 0x978   :  { %1349 = vsyncpa [#allocation4], 1 }

</bundles_post_ra>
